<compile_context>
chip_gen: v7x
topology: tpu7x:2x2x1
jax: 0.10.0
libtpu: 0.0.40
codegen_flags: <defaults>
</compile_context>

<pallas_src>
import math

import jax
import jax.numpy as jnp
from jax.experimental import pallas as pl
from jax.experimental.pallas import tpu as pltpu

LANE = 128


# -----------------------------------------------------------------------------
# Pallas kernel: one fused NGCF layer, tiled (row tiles x K tiles)
# -----------------------------------------------------------------------------
def _ngcf_layer_kernel(a_ref, hk_ref, hloc_ref, w1_ref, w2_ref, o_ref, acc_ref):
    k = pl.program_id(1)

    @pl.when(k == 0)
    def _init():
        acc_ref[...] = jnp.zeros_like(acc_ref)

    # Neighbor aggregation: AH[row_tile] += A[row_tile, k_tile] @ H[k_tile, :]
    # bf16 inputs, f32 accumulation on the MXU.
    acc_ref[...] += jnp.dot(a_ref[...], hk_ref[...],
                            preferred_element_type=jnp.float32)

    @pl.when(k == pl.num_programs(1) - 1)
    def _finalize():
        ah = acc_ref[...]                               # (TM, Din_pad) f32
        h_loc = hloc_ref[...].astype(jnp.float32)       # destination-node features

        # m = (AH + H) @ W1^T + (AH * H) @ W2^T   (two MXU matmuls, f32 accum)
        m = jnp.dot((ah + h_loc).astype(jnp.bfloat16), w1_ref[...],
                    preferred_element_type=jnp.float32)
        m = m + jnp.dot((ah * h_loc).astype(jnp.bfloat16), w2_ref[...],
                        preferred_element_type=jnp.float32)

        # LeakyReLU(0.2); message_dropout = 0.0 -> identity.
        h_out = jnp.maximum(m, 0.2 * m)

        # Row-wise L2 normalize (F.normalize p=2 dim=1, eps=1e-12):
        # h / max(||h||, 1e-12) == h * rsqrt(max(sumsq, 1e-24)).
        sumsq = jnp.sum(h_out * h_out, axis=1, keepdims=True)
        h_out = h_out * jax.lax.rsqrt(jnp.maximum(sumsq, 1e-24))

        o_ref[...] = h_out.astype(o_ref.dtype)


# -----------------------------------------------------------------------------
# Wrapper: padding, weight transpose, pallas_call
# -----------------------------------------------------------------------------
def _round_up(x, m):
    return ((x + m - 1) // m) * m


def _pad2d(x, rows, cols, dtype):
    out = jnp.zeros((rows, cols), dtype)
    return out.at[: x.shape[0], : x.shape[1]].set(x.astype(dtype))


def _vmem_tile_bytes(tile_m, tile_k, d_in_pad, d_out_pad):
    bf16, f32 = 2, 4
    a = 2 * tile_m * tile_k * bf16             # A tile, double-buffered
    hk = 2 * tile_k * d_in_pad * bf16          # H source (K) tile, double-buffered
    hl = 2 * tile_m * d_in_pad * bf16          # H destination tile
    w = 2 * 2 * d_in_pad * d_out_pad * bf16    # W1^T + W2^T
    acc = tile_m * d_in_pad * f32              # AH accumulator scratch
    out = 2 * tile_m * d_out_pad * f32         # output tile
    return a + hk + hl + w + acc + out


def ngcf_layer(adj_p, h, w1, w2, *, n_valid, tile_m, tile_k):
    """One NGCF layer.

    adj_p : (N_pad, N_pad) bf16 padded normalized adjacency (prepared once outside).
    h     : (N, D_in) f32 node features (unpadded).
    w1,w2 : (D_out, D_in) f32, torch Linear convention.
    Returns (N, D_out) f32.
    """
    n_pad = adj_p.shape[0]
    d_in = h.shape[1]
    d_out = w1.shape[0]
    d_in_pad = _round_up(d_in, LANE)
    d_out_pad = _round_up(d_out, LANE)

    assert n_pad % tile_m == 0 and n_pad % tile_k == 0
    assert tile_m % 8 == 0 and tile_k % LANE == 0

    # Pad features (rows + lanes) and cast to bf16 for the MXU.
    h_p = _pad2d(h, n_pad, d_in_pad, jnp.bfloat16)

    # Lane-padded transposed weights (kept separate -> no in-kernel concat copies).
    w1t = _pad2d(w1.T, d_in_pad, d_out_pad, jnp.bfloat16)
    w2t = _pad2d(w2.T, d_in_pad, d_out_pad, jnp.bfloat16)

    grid = (n_pad // tile_m, n_pad // tile_k)

    est = _vmem_tile_bytes(tile_m, tile_k, d_in_pad, d_out_pad)
    vmem_limit = int(min(max(2 * est, 16 * 1024 * 1024), 48 * 1024 * 1024))

    out_p = pl.pallas_call(
        _ngcf_layer_kernel,
        out_shape=jax.ShapeDtypeStruct((n_pad, d_out_pad), jnp.float32),
        grid=grid,
        in_specs=[
            pl.BlockSpec((tile_m, tile_k), lambda i, k: (i, k)),        # A tile
            pl.BlockSpec((tile_k, d_in_pad), lambda i, k: (k, 0)),      # H source (K) tile
            pl.BlockSpec((tile_m, d_in_pad), lambda i, k: (i, 0)),      # H destination tile
            pl.BlockSpec((d_in_pad, d_out_pad), lambda i, k: (0, 0)),   # W1^T
            pl.BlockSpec((d_in_pad, d_out_pad), lambda i, k: (0, 0)),   # W2^T
        ],
        out_specs=pl.BlockSpec((tile_m, d_out_pad), lambda i, k: (i, 0)),
        scratch_shapes=[pltpu.VMEM((tile_m, d_in_pad), jnp.float32)],   # AH accumulator
        compiler_params=pltpu.CompilerParams(
            dimension_semantics=("parallel", "arbitrary"),
            vmem_limit_bytes=vmem_limit,
        ),
    )(adj_p, h_p, h_p, w1t, w2t)

    return out_p[:n_valid, :d_out]


# -----------------------------------------------------------------------------
# Parameter / graph construction (plain JAX glue)
# -----------------------------------------------------------------------------
def xavier_uniform(key, shape):
    fan_out, fan_in = shape[0], shape[1]
    bound = jnp.sqrt(6.0 / (fan_in + fan_out))
    return jax.random.uniform(key, shape, jnp.float32, -bound, bound)


def build_graph(key, user_num, item_num):
    """Dense symmetric-normalized adjacency from synthetic interactions."""
    n = user_num + item_num
    # guarantee every node has at least one edge
    base_u = jnp.arange(item_num) % user_num
    base_i = jnp.arange(item_num) + user_num
    k1, k2 = jax.random.split(key)
    extra_u = jax.random.randint(k1, (2 * n,), 0, user_num)
    extra_i = jax.random.randint(k2, (2 * n,), 0, item_num) + user_num
    src = jnp.concatenate([base_u, extra_u])
    dst = jnp.concatenate([base_i, extra_i])

    adj = jnp.zeros((n, n), jnp.float32)
    adj = adj.at[src, dst].set(1.0)
    adj = adj.at[dst, src].set(1.0)          # bidirectional (as in node_dropout_fn)

    deg = jnp.sum(adj, axis=1)
    norm = jnp.where(deg > 0, deg ** -0.5, 0.0)
    # edge_weight = norm[src] * norm[dst]; node_dropout = 0.0 -> keep all edges
    return adj * norm[:, None] * norm[None, :]


# -----------------------------------------------------------------------------
# Pure-JAX reference (for a loose numerical sanity check)
# -----------------------------------------------------------------------------
def ngcf_layer_ref(adj, h, w1, w2):
    ah = adj @ h
    m = (ah + h) @ w1.T + (ah * h) @ w2.T
    m = jnp.where(m > 0, m, 0.2 * m)
    norm = jnp.sqrt(jnp.sum(m * m, axis=1, keepdims=True))
    return m / jnp.maximum(norm, 1e-12)


# -----------------------------------------------------------------------------
# Full NGCF forward (embedding tables -> layers -> BPR loss)
# -----------------------------------------------------------------------------
def ngcf_forward(params, adj, user_ids, item_ids, neg_item_ids, lmbd,
                 *, tile_m=256, tile_k=512):
    user_emb = params["user_emb"]
    item_emb = params["item_emb"]
    user_num = user_emb.shape[0]
    n = adj.shape[0]

    # Tile selection / padding: clamp perf-tuned defaults to the (128-aligned) problem.
    n128 = _round_up(n, LANE)
    tile_m = min(tile_m, n128)
    tile_k = min(tile_k, n128)
    n_pad = _round_up(n, math.lcm(tile_m, tile_k))

    # Pad + cast the dense normalized adjacency to bf16 ONCE (shared by all layers).
    adj_p = _pad2d(adj, n_pad, n_pad, jnp.bfloat16)

    final_user = [user_emb]
    final_item = [item_emb]

    h = jnp.concatenate([user_emb, item_emb], axis=0)
    for (w1, w2) in params["layers"]:
        h = ngcf_layer(adj_p, h, w1, w2, n_valid=n, tile_m=tile_m, tile_k=tile_k)
        final_user.append(h[:user_num])
        final_item.append(h[user_num:])

    final_user = jnp.concatenate(final_user, axis=1)
    final_item = jnp.concatenate(final_item, axis=1)

    # BPR loss + L2 regularizer (custom_loss) -- small gather/reduce kept in JAX glue.
    u = final_user[user_ids]
    p = final_item[item_ids]
    ng = final_item[neg_item_ids]
    pos_scores = jnp.sum(u * p, axis=1)
    neg_scores = jnp.sum(u * ng, axis=1)
    loss = -jnp.mean(jnp.log(jax.nn.sigmoid(pos_scores - neg_scores)))
    reg = (jnp.sum(u ** 2) + jnp.sum(p ** 2) + jnp.sum(ng ** 2)) / 2.0
    total = loss + lmbd * reg / u.shape[0]
    return {"loss": total,
            "user_embedding": final_user,
            "item_embedding": final_item}


# -----------------------------------------------------------------------------
# Main
# -----------------------------------------------------------------------------
if __name__ == "__main__":
    user_num, item_num = 96, 160          # N = 256 nodes
    embedding_dim = 32
    hidden_units = [32, 32]
    lmbd = 1e-5
    batch = 8

    key = jax.random.PRNGKey(0)
    keys = jax.random.split(key, 10)

    params = {
        "user_emb": xavier_uniform(keys[0], (user_num, embedding_dim)),
        "item_emb": xavier_uniform(keys[1], (item_num, embedding_dim)),
        "layers": [],
    }
    dims = [embedding_dim] + hidden_units
    for li in range(len(dims) - 1):
        w1 = xavier_uniform(keys[2 + 2 * li], (dims[li + 1], dims[li]))
        w2 = xavier_uniform(keys[3 + 2 * li], (dims[li + 1], dims[li]))
        params["layers"].append((w1, w2))

    adj = build_graph(keys[8], user_num, item_num)

    kk = jax.random.split(keys[9], 3)
    user_ids = jax.random.randint(kk[0], (batch,), 0, user_num)
    item_ids = jax.random.randint(kk[1], (batch,), 0, item_num)
    neg_item_ids = jax.random.randint(kk[2], (batch,), 0, item_num)

    # Small demo tiles (128x128) so the 2-D (row, K) grid and the K-axis accumulation
    # pipeline are actually exercised at N=256; production defaults are tile_m=256, tile_k=512.
    out = ngcf_forward(params, adj, user_ids, item_ids, neg_item_ids, lmbd,
                       tile_m=128, tile_k=128)
    jax.block_until_ready(out["loss"])
    jax.block_until_ready(out["user_embedding"])
    jax.block_until_ready(out["item_embedding"])

    assert out["user_embedding"].shape == (user_num, embedding_dim * 3)
    assert out["item_embedding"].shape == (item_num, embedding_dim * 3)
    assert bool(jnp.isfinite(out["loss"]))

    # Loose numerical sanity check vs a pure-JAX f32 reference (kernel uses bf16 MXU inputs).
    h_ref = jnp.concatenate([params["user_emb"], params["item_emb"]], axis=0)
    ref_user = [params["user_emb"]]
    ref_item = [params["item_emb"]]
    for (w1, w2) in params["layers"]:
        h_ref = ngcf_layer_ref(adj, h_ref, w1, w2)
        ref_user.append(h_ref[:user_num])
        ref_item.append(h_ref[user_num:])
    ref_user = jnp.concatenate(ref_user, axis=1)
    ref_item = jnp.concatenate(ref_item, axis=1)
    err_u = float(jnp.max(jnp.abs(out["user_embedding"] - ref_user)))
    err_i = float(jnp.max(jnp.abs(out["item_embedding"] - ref_item)))
    assert err_u < 0.1 and err_i < 0.1, (err_u, err_i)

    print("KERNEL_OK")
</pallas_src>

<mosaic_0001>
module attributes {stable_mosaic.version = 11 : i64} {
  func.func @_ngcf_layer_kernel(%arg0: i32, %arg1: i32, %arg2: memref<128x128xbf16, #tpu.memory_space<vmem>>, %arg3: memref<128x128xbf16, #tpu.memory_space<vmem>>, %arg4: memref<128x128xbf16, #tpu.memory_space<vmem>>, %arg5: memref<128x128xbf16, #tpu.memory_space<vmem>>, %arg6: memref<128x128xbf16, #tpu.memory_space<vmem>>, %arg7: memref<128x128xf32, #tpu.memory_space<vmem>>, %arg8: memref<128x128xf32, #tpu.memory_space<vmem>>) attributes {dimension_semantics = [#tpu.dimension_semantics<parallel>, #tpu.dimension_semantics<arbitrary>], iteration_bounds = array<i64: 2, 2>, scalar_prefetch = 0 : i64, scratch_operands = 1 : i64, tpu.core_type = #tpu.core_type<tc>, window_params = [{transform_indices = @transform_0, window_bounds = array<i64: 128, 128>}, {transform_indices = @transform_1, window_bounds = array<i64: 128, 128>}, {transform_indices = @transform_2, window_bounds = array<i64: 128, 128>}, {pipeline_mode = #tpu.pipeline_mode<synchronous>, transform_indices = @transform_3, window_bounds = array<i64: 128, 128>}, {pipeline_mode = #tpu.pipeline_mode<synchronous>, transform_indices = @transform_4, window_bounds = array<i64: 128, 128>}, {transform_indices = @transform_5, window_bounds = array<i64: 128, 128>}]} {
    %c0_i32 = arith.constant 0 : i32
    %0 = arith.cmpi eq, %arg1, %c0_i32 : i32
    %1 = arith.extui %0 : i1 to i32
    %c0_i32_0 = arith.constant 0 : i32
    %2 = arith.cmpi ne, %1, %c0_i32_0 : i32
    scf.if %2 {
      %cst_9 = arith.constant 0.000000e+00 : f32
      %12 = vector.broadcast %cst_9 : f32 to vector<128x128xf32>
      %c0_10 = arith.constant 0 : index
      %c0_11 = arith.constant 0 : index
      %13 = vector.load %arg8[%c0_10, %c0_11] : memref<128x128xf32, #tpu.memory_space<vmem>>, vector<128x128xf32>
      tpu.vector_store %arg8[%c0_10, %c0_11], %12 {strides = array<i32>} : memref<128x128xf32, #tpu.memory_space<vmem>>, vector<128x128xf32>,
    } else {
    }
    %c0 = arith.constant 0 : index
    %c0_1 = arith.constant 0 : index
    %3 = vector.load %arg8[%c0, %c0_1] : memref<128x128xf32, #tpu.memory_space<vmem>>, vector<128x128xf32>
    %c0_2 = arith.constant 0 : index
    %c0_3 = arith.constant 0 : index
    %4 = vector.load %arg2[%c0_2, %c0_3] : memref<128x128xbf16, #tpu.memory_space<vmem>>, vector<128x128xbf16>
    %c0_4 = arith.constant 0 : index
    %c0_5 = arith.constant 0 : index
    %5 = vector.load %arg3[%c0_4, %c0_5] : memref<128x128xbf16, #tpu.memory_space<vmem>>, vector<128x128xbf16>
    %cst = arith.constant dense<0.000000e+00> : vector<128x128xf32>
    %6 = tpu.matmul %4, %5, %cst {dimension_numbers = #tpu.dot_dimension_numbers<[1], [0], [0], [1], [0, 0, 1, 1], [], []>} : vector<128x128xbf16>, vector<128x128xbf16>, vector<128x128xf32> -> vector<128x128xf32>
    %7 = arith.addf %3, %6 : vector<128x128xf32>
    %c0_6 = arith.constant 0 : index
    %c0_7 = arith.constant 0 : index
    %8 = vector.load %arg8[%c0_6, %c0_7] : memref<128x128xf32, #tpu.memory_space<vmem>>, vector<128x128xf32>
    tpu.vector_store %arg8[%c0_6, %c0_7], %7 {strides = array<i32>} : memref<128x128xf32, #tpu.memory_space<vmem>>, vector<128x128xf32>,
    %c1_i32 = arith.constant 1 : i32
    %9 = arith.cmpi eq, %arg1, %c1_i32 : i32
    %10 = arith.extui %9 : i1 to i32
    %c0_i32_8 = arith.constant 0 : i32
    %11 = arith.cmpi ne, %10, %c0_i32_8 : i32
    scf.if %11 {
      %c0_9 = arith.constant 0 : index
      %c0_10 = arith.constant 0 : index
      %12 = vector.load %arg8[%c0_9, %c0_10] : memref<128x128xf32, #tpu.memory_space<vmem>>, vector<128x128xf32>
      %c0_11 = arith.constant 0 : index
      %c0_12 = arith.constant 0 : index
      %13 = vector.load %arg4[%c0_11, %c0_12] : memref<128x128xbf16, #tpu.memory_space<vmem>>, vector<128x128xbf16>
      %14 = arith.extf %13 : vector<128x128xbf16> to vector<128x128xf32>
      %15 = arith.addf %12, %14 : vector<128x128xf32>
      %16 = arith.truncf %15 : vector<128x128xf32> to vector<128x128xbf16>
      %c0_13 = arith.constant 0 : index
      %c0_14 = arith.constant 0 : index
      %17 = vector.load %arg5[%c0_13, %c0_14] : memref<128x128xbf16, #tpu.memory_space<vmem>>, vector<128x128xbf16>
      %cst_15 = arith.constant dense<0.000000e+00> : vector<128x128xf32>
      %18 = tpu.matmul %16, %17, %cst_15 {dimension_numbers = #tpu.dot_dimension_numbers<[1], [0], [0], [1], [0, 0, 1, 1], [], []>} : vector<128x128xbf16>, vector<128x128xbf16>, vector<128x128xf32> -> vector<128x128xf32>
      %19 = arith.mulf %12, %14 : vector<128x128xf32>
      %20 = arith.truncf %19 : vector<128x128xf32> to vector<128x128xbf16>
      %c0_16 = arith.constant 0 : index
      %c0_17 = arith.constant 0 : index
      %21 = vector.load %arg6[%c0_16, %c0_17] : memref<128x128xbf16, #tpu.memory_space<vmem>>, vector<128x128xbf16>
      %cst_18 = arith.constant dense<0.000000e+00> : vector<128x128xf32>
      %22 = tpu.matmul %20, %21, %cst_18 {dimension_numbers = #tpu.dot_dimension_numbers<[1], [0], [0], [1], [0, 0, 1, 1], [], []>} : vector<128x128xbf16>, vector<128x128xbf16>, vector<128x128xf32> -> vector<128x128xf32>
      %23 = arith.addf %18, %22 : vector<128x128xf32>
      %cst_19 = arith.constant 2.000000e-01 : f32
      %24 = vector.broadcast %cst_19 : f32 to vector<128x128xf32>
      %25 = arith.mulf %24, %23 : vector<128x128xf32>
      %26 = arith.maximumf %23, %25 : vector<128x128xf32>
      %27 = arith.mulf %26, %26 : vector<128x128xf32>
      %cst_20 = arith.constant dense<0.000000e+00> : vector<128xf32>
      %28 = vector.multi_reduction <add>, %27, %cst_20 [1] : vector<128x128xf32> to vector<128xf32>
      %29 = vector.shape_cast %28 : vector<128xf32> to vector<128x1xf32>
      %cst_21 = arith.constant 1.000000e-24 : f32
      %30 = vector.broadcast %cst_21 : f32 to vector<128x1xf32>
      %31 = arith.maximumf %29, %30 : vector<128x1xf32>
      %32 = math.rsqrt %31 : vector<128x1xf32>
      %33 = vector.broadcast %32 : vector<128x1xf32> to vector<128x128xf32>
      %34 = arith.mulf %26, %33 : vector<128x128xf32>
      %c0_22 = arith.constant 0 : index
      %c0_23 = arith.constant 0 : index
      %35 = vector.load %arg7[%c0_22, %c0_23] : memref<128x128xf32, #tpu.memory_space<vmem>>, vector<128x128xf32>
      tpu.vector_store %arg7[%c0_22, %c0_23], %34 {strides = array<i32>} : memref<128x128xf32, #tpu.memory_space<vmem>>, vector<128x128xf32>,
    } else {
    }
    return
  }
  func.func @transform_0(%arg0: i32, %arg1: i32) -> (i32, i32) {
    %c0_i32 = arith.constant 0 : i32
    return %arg0, %arg1 : i32, i32
  }
  func.func @transform_1(%arg0: i32, %arg1: i32) -> (i32, i32) {
    %c0_i32 = arith.constant 0 : i32
    %c0_i32_0 = arith.constant 0 : i32
    return %arg1, %c0_i32 : i32, i32
  }
  func.func @transform_2(%arg0: i32, %arg1: i32) -> (i32, i32) {
    %c0_i32 = arith.constant 0 : i32
    %c0_i32_0 = arith.constant 0 : i32
    return %arg0, %c0_i32 : i32, i32
  }
  func.func @transform_3(%arg0: i32, %arg1: i32) -> (i32, i32) {
    %c0_i32 = arith.constant 0 : i32
    %c0_i32_0 = arith.constant 0 : i32
    %c0_i32_1 = arith.constant 0 : i32
    return %c0_i32, %c0_i32_0 : i32, i32
  }
  func.func @transform_4(%arg0: i32, %arg1: i32) -> (i32, i32) {
    %c0_i32 = arith.constant 0 : i32
    %c0_i32_0 = arith.constant 0 : i32
    %c0_i32_1 = arith.constant 0 : i32
    return %c0_i32, %c0_i32_0 : i32, i32
  }
  func.func @transform_5(%arg0: i32, %arg1: i32) -> (i32, i32) {
    %c0_i32 = arith.constant 0 : i32
    %c0_i32_0 = arith.constant 0 : i32
    return %arg0, %c0_i32 : i32, i32
  }
}

</mosaic_0001>

<bundles_post_ra>
// kernel: tpu_custom_call.1
= control target key start
LH: loop header
LB: loop body
LE: loop exit
PB: predicated region body
PF: predicated region fallthrough
CT: control target
= control target key end

     0   :  { %s2861_s0 = inlined_call_operand.hbm [shape: bf16[256,256], index: 0, kind: input, shape index: {}]   ;;  %s2862_s1 = inlined_call_operand.hbm [shape: bf16[256,128], index: 1, kind: input, shape index: {}]   ;;  %s2863_s2 = inlined_call_operand.hbm [shape: bf16[256,128], index: 2, kind: input, shape index: {}]   ;;  %s2864_s3 = inlined_call_operand.hbm [shape: bf16[128,128], index: 3, kind: input, shape index: {}]   ;;  %s2865_s4 = inlined_call_operand.hbm [shape: bf16[128,128], index: 4, kind: input, shape index: {}]   ;;  %s2866_s5 = inlined_call_operand.hbm [shape: f32[256,128], index: 5, kind: output, shape index: {}]  }
   0x1   :  { %2886 = sst [smem:[#allocation26_spill]] %s2861_s0 }
   0x2   :  { %2887 = sst [smem:[#allocation27_spill]] %s2862_s1 }
   0x3   :  { %2888 = sst [smem:[#allocation28_spill]] %s2864_s3 }
   0x4   :  { %2889 = sst [smem:[#allocation29_spill]] %s2866_s5 }
   0x5   :  { %10 = vsyncpa [#allocation4], 0 }
   0x6   :  { %12 = vsyncpa [#allocation4 + $0x1], 0 }
   0x7   :  { %13 = vsyncpa [#allocation7], 0 }
   0x8   :  { %15 = vsyncpa [#allocation7 + $0x1], 0 }
   0x9   :  { %16 = vsyncpa [#allocation10], 0 }
   0xa   :  { %17 = vsyncpa [#allocation5], 0 }
   0xb   :  { %19 = vsyncpa [#allocation5 + $0x1], 0  ;;  %s2247_s18 = smov 0   ;;  %s2249_s19 = smov 0  }
   0xc   :  { %s2251_s20 = smov 0   ;;  %s2253_s21 = smov 0  }
   0xd   :  { %s2255_s22 = smov 0   ;;  %s2257_s23 = smov 0  }
   0xe   :  { %s2259_s24 = smov 0   ;;  %s2261_s25 = smov 0  }
   0xf   :  { %s2263_s26 = smov 0   ;;  %s2265_s27 = smov 0  }
  0x10   :  { %s2267_s28 = smov 0   ;;  %s2269_s29 = smov 0  }
  0x11   :  { %s2271_s30 = smov 0   ;;  %s2273_s6 = smov 0  }
  0x12 LB: > { %2890 = sst [smem:[#allocation18_spill]] %s2167_s22  ;;  %s2318_s7 = sadd.s32 4294967295, %s2203_s6   ;;  %s2203_s6 = sphi %s2273_s6, %s25_s6   ;;  %s2199_s30 = sphi %s2271_s30, %s2960_s30   ;;  %s2195_s29 = sphi %s2269_s29, %s2959_s29   ;;  %s2191_s28 = sphi %s2267_s28, %s2958_s28   ;;  %s2187_s27 = sphi %s2265_s27, %s2957_s27   ;;  %s2183_s26 = sphi %s2263_s26, %s2956_s26   ;;  %s2179_s25 = sphi %s2261_s25, %s2955_s25   ;;  %s2175_s24 = sphi %s2259_s24, %s2954_s24   ;;  %s2171_s23 = sphi %s2257_s23, %s2953_s23   ;;  %s2167_s22 = sphi %s2255_s22, %s2952_s22   ;;  %s2163_s21 = sphi %s2253_s21, %s2951_s21   ;;  %s2159_s20 = sphi %s2251_s20, %s2950_s20   ;;  %s2155_s19 = sphi %s2249_s19, %s2949_s19   ;;  %s2151_s18 = sphi %s2247_s18, %s2948_s18  }
  0x13   : > { %2891 = sst [smem:[#allocation19_spill]] %s2171_s23  ;;  %p1393_p0 = scmp.ge.s32.totalorder %s2203_s6, 1 }
  0x14   : > { %2892 = sst [smem:[#allocation20_spill]] %s2187_s27  ;;  %p2867_p1 = scmp.eq.s32.totalorder %s2318_s7, 0 }
  0x15   : > { %2893 = sst [smem:[#allocation21_spill]] %s2191_s28  ;;  %p190_p3 = scmp.lt.s32.totalorder %s2203_s6, 5 }
  0x16   : > { %s2205_s9 = smov [#allocation9]   ;;  %s2896_s3 = sld [smem:[#allocation28_spill]] }
  0x17   : > { %p2324_p4 = pnand %p1393_p0, %p190_p3  ;;  %s202_s10 = sshll.u32 %s2205_s9, 4  ;;  %s203_s10 = int_to_ptr.vmem [resolvable:$true] %s202_s10 }
  0x19   : > { %s2894_s8 = scalar_select %p2324_p4, 1, 0 }
  0x1a   : > { %p1688_p5 = pneg %p2324_p4 }
  0x1c   : > { %p2332_p6 = pnand %p1688_p5, %p2867_p1  ;;  %s1899_s14 = scalar_lea.hbm %s2896_s3, 1024 }
  0x1d   : > { %p1900_p7 = scmp.ne.s32.totalorder %s2896_s3, %s1899_s14  ;;  %p1906_p11 = scmp.lt.u32.totalorder %s1899_s14, %s2896_s3 }
  0x1e   : > { %p2882_p8 = pneg %p2332_p6 }
  0x20   : > { %p1902_p9 = pnand %p2882_p8, %p1900_p7 }
  0x22   : > { %p1903_p10 = pneg %p1902_p9 }
  0x24   : > { %p1908_p12 = pnand %p1906_p11, %p1903_p10 }
  0x26   : > { %1911 = shalt.err (!%p1908_p12)
}
  0x27   : > { %s1912_s12 = scalar_lea.vmem %s203_s10, 1024  ;;  %p1920_p5 = scmp.lt.s32.totalorder %s203_s10, %s203_s10 }
  0x28   : > { %p1913_p13 = scmp.ne.s32.totalorder %s203_s10, %s1912_s12  ;;  %p1921_p2 = scmp.lt.s32.totalorder %s1912_s12, %s1912_s12 }
  0x2a   : > { %p1915_p0 = pnand %p1913_p13, %p2882_p8  ;;  %p1922_p1 = por %p1921_p2, %p1920_p5 }
  0x2c   : > { %p1916_p3 = pneg %p1915_p0 }
  0x2e   : > { %p1923_p4 = pnand %p1922_p1, %p1916_p3 }
  0x30   : > { %1926 = shalt.err (!%p1923_p4)
}
  0x31   : > { %s2870_s13 = smov 64   ;;  %s2872_s14 = smov 4  }
  0x32   : > { %1691 = dma.hbm_to_vmem [thread:$0]  (!%p2332_p6), %s2896_s3, 1024, %s203_s10, [#allocation10], %s2870_s13, %s2870_s13, %s2872_s14  }
  0x33   : > { %s34_s17 = sadd.s32 1, %s2195_s29  ;;  %s37_s9 = sadd.s32 1, %s2199_s30 }
  0x34   : > { %p35_p1 = scmp.ge.s32.totalorder %s34_s17, 2  ;;  %p2881_p2 = scmp.eq.s32.totalorder %s2203_s6, 0 }
  0x35   : > { %s72_s12 = sadd.s32 1, %s2171_s23  ;;  %p79_p4 = scmp.ne.s32.totalorder %s2171_s23, %s2167_s22 }
  0x36   : > { %s2962_s17 = smov (%p35_p1, %s34_s17), 0  ;;  %s2964_s9 = smov (!%p35_p1, %s37_s9), %s2199_s30 }
  0x37   : > { %2897 = sst [smem:[#allocation22_spill]] %s2962_s17  ;;  %s42_s5 = ssub.s32 %s2195_s29, %s2962_s17 }
  0x38   : > { %p2374_p7 = por %p79_p4, %p2881_p2  ;;  %p39_p9 = scmp.ge.s32.totalorder %s2964_s9, 2 }
  0x39   : > { %p70_p10 = scmp.eq.s32.totalorder %s42_s5, 0  ;;  %p85_p11 = scmp.ne.s32.totalorder %s2167_s22, %s2163_s21 }
  0x3a   : > { %p2880_p12 = scmp.lt.s32.totalorder %s2203_s6, 4  ;;  %s2966_s9 = smov (%p39_p9, %s2964_s9), 0 }
  0x3b   : > { %2899 = sst [smem:[#allocation23_spill]] %s2966_s9  ;;  %s2388_s16 = ssub.s32 %s2199_s30, %s2966_s9 }
  0x3c   : > { %s2384_s15 = scalar_select %p70_p10, %s2171_s23, %s72_s12  }
  0x3d   : > { %p2901_p13 = scmp.eq.s32.totalorder %s2318_s7, 0  ;;  %s43_s14 = sor.u32 %s42_s5, %s2388_s16 }
  0x3e   : > { %2900 = sst [smem:[#allocation24_spill]] %s2384_s15  ;;  %p2398_p5 = scmp.eq.s32.totalorder %s43_s14, 0 }
  0x3f   : > { %p2392_p0 = por %p85_p11, %p2901_p13  ;;  %s252_s3 = sand.u32 1, %s2203_s6  }
  0x40   : > { %s2904_s21 = scalar_select %p2398_p5, 1, 0 }
  0x41   : > { %s2902_s13 = scalar_select %p2392_p0, 1, 0 }
  0x42   : > { %s254_s17 = sand.u32 1, %s2171_s23   ;;  %s1454_s12 = sshll.u32 %s2195_s29, 10 }
  0x43   : > { %2903 = sst [smem:[#allocation25_spill]] %s2902_s13  ;;  %s1401_s28 = sshll.u32 %s254_s17, 6 }
  0x44   : > { %s2905_s1 = sld [smem:[#allocation27_spill]]  ;;  %s256_s22 = scalar_lea.vmem [#allocation6], %s1401_s28 }
  0x45   : > { %s263_s5 = sshll.u32 %s256_s22, 4  ;;  %p2414_p1 = pnand %p2880_p12, %p2374_p7  ;;  %s2418_s5 = int_to_ptr.vmem [resolvable:$true] %s263_s5 }
  0x46   : > { %s2208_s17 = smov [#allocation11]   ;;  %s2422_s15 = scalar_lea.sflag [#allocation7], %s252_s3 }
  0x47   : > { %s2420_s9 = sshll.u32 %s2208_s17, 4  ;;  %p1929_p9 = pneg %p2414_p1  ;;  %s216_s9 = int_to_ptr.vmem [resolvable:$true] %s2420_s9 }
  0x4a   : > { %s2408_s27 = scalar_lea.hbm %s2905_s1, %s1454_s12  ;;  %s1932_s10 = scalar_lea.hbm %s2905_s1, 2048 }
  0x4b   : > { %s1927_s12 = scalar_lea.hbm %s2408_s27, 1024  ;;  %p1933_p11 = scmp.lt.u32.totalorder %s2408_s27, %s2905_s1 }
  0x4c   : > { %p1928_p4 = scmp.ne.s32.totalorder %s2408_s27, %s1927_s12  ;;  %p1934_p13 = scmp.lt.u32.totalorder %s1932_s10, %s1927_s12 }
  0x4d   : > { %p1936_p12 = scmp.lt.u32.totalorder %s1927_s12, %s2408_s27 }
  0x4e   : > { %p1930_p10 = pnand %p1929_p9, %p1928_p4  ;;  %p1935_p3 = por %p1934_p13, %p1933_p11 }
  0x50   : > { %p1931_p7 = pneg %p1930_p10  ;;  %p1937_p2 = por %p1936_p12, %p1935_p3 }
  0x52   : > { %p1938_p8 = pnand %p1937_p2, %p1931_p7 }
  0x54   : > { %1941 = shalt.err (!%p1938_p8)
}
  0x55   : > { %s1942_s3 = scalar_lea.vmem %s2418_s5, 1024  ;;  %s2209_s17 = smov [#allocation6]  }
  0x56   : > { %p1943_p4 = scmp.ne.s32.totalorder %s2418_s5, %s1942_s3  ;;  %s1947_s22 = sshll.u32 %s2209_s17, 4  ;;  %s1948_s22 = int_to_ptr.vmem [resolvable:$false] %s1947_s22 }
  0x57   : > { %s1949_s23 = scalar_lea.vmem %s1948_s22, 2048  ;;  %p1950_p5 = scmp.lt.s32.totalorder %s2418_s5, %s1948_s22 }
  0x58   : > { %p1945_p10 = pnand %p1943_p4, %p1929_p9  ;;  %p1951_p11 = scmp.lt.s32.totalorder %s1949_s23, %s1942_s3 }
  0x5a   : > { %p1946_p0 = pneg %p1945_p10  ;;  %p1952_p13 = por %p1951_p11, %p1950_p5 }
  0x5c   : > { %p1953_p12 = pnand %p1952_p13, %p1946_p0 }
  0x5e   : > { %1956 = shalt.err (!%p1953_p12)
}
  0x5f   : > { %s2907_s13 = smov 4   ;;  %s2908_s12 = smov 64  }
  0x60   : > { %1701 = dma.hbm_to_vmem [thread:$0]  (!%p2414_p1), %s2408_s27, 1024, %s2418_s5, %s2422_s15, %s2908_s12, %s2908_s12, %s2907_s13  }
  0x61   : > { %s1957_s17 = scalar_lea.hbm %s2865_s4, 1024  ;;  %p2909_p2 = pneg %p2332_p6 }
  0x62   : > { %p1958_p8 = scmp.ne.s32.totalorder %s2865_s4, %s1957_s17  ;;  %p1964_p5 = scmp.lt.u32.totalorder %s1957_s17, %s2865_s4 }
  0x64   : > { %p1960_p0 = pnand %p1958_p8, %p2909_p2 }
  0x66   : > { %p1961_p3 = pneg %p1960_p0 }
  0x68   : > { %p1966_p9 = pnand %p1964_p5, %p1961_p3 }
  0x6a   : > { %1969 = shalt.err (!%p1966_p9)
}
  0x6b   : > { %s1970_s27 = scalar_lea.vmem %s216_s9, 1024  ;;  %p2910_p7 = pmov %p2909_p2 }
  0x6c   : > { %p1971_p1 = scmp.ne.s32.totalorder %s216_s9, %s1970_s27  ;;  %p1978_p11 = scmp.lt.s32.totalorder %s216_s9, %s216_s9 }
  0x6d   : > { %p1979_p13 = scmp.lt.s32.totalorder %s1970_s27, %s1970_s27 }
  0x6e   : > { %p1973_p4 = pnand %p1971_p1, %p2910_p7 }
  0x6f   : > { %p1980_p12 = por %p1979_p13, %p1978_p11 }
  0x70   : > { %p1974_p10 = pneg %p1973_p4 }
  0x72   : > { %p1981_p2 = pnand %p1980_p12, %p1974_p10 }
  0x74   : > { %1984 = shalt.err (!%p1981_p2)
}
  0x75   : > { %1694 = dma.hbm_to_vmem [thread:$0]  (!%p2332_p6), %s2865_s4, 1024, %s216_s9, [#allocation10], %s2908_s12, %s2908_s12, %s2907_s13  }
  0x76   : > { %s46_s11 = sadd.s32 1, %s2183_s26  ;;  %p2911_p8 = scmp.ne.s32.totalorder %s2904_s21, 0 }
  0x77   : > { %p53_p0 = scmp.ne.s32.totalorder %s2183_s26, %s2179_s25  ;;  %p59_p3 = scmp.ne.s32.totalorder %s2179_s25, %s2175_s24 }
  0x78   : > { %s2481_s10 = scalar_select %p2911_p8, %s2183_s26, %s46_s11  }
  0x79   : > { %s229_s17 = sand.u32 1, %s2183_s26   ;;  %s1453_s3 = sshll.u32 %s2199_s30, 5 }
  0x7a   : > { %p2912_p5 = scmp.eq.s32.totalorder %s2203_s6, 0  ;;  %p2913_p1 = scmp.eq.s32.totalorder %s2318_s7, 0 }
  0x7b   : > { %s1397_s14 = sshll.u32 %s229_s17, 6  ;;  %s239_s23 = sadd.s32 %s2195_s29, %s1453_s3 }
  0x7c   : > { %p55_p9 = por %p2912_p5, %p53_p0  ;;  %p2493_p7 = por %p2913_p1, %p59_p3 }
  0x7d   : > { %s1400_s27 = sshll.u32 %s239_s23, 6  ;;  %s233_s9 = scalar_lea.vmem [#allocation3], %s1397_s14 }
  0x7e   : > { %s242_s5 = sshll.u32 %s233_s9, 4  ;;  %s2915_s0 = sld [smem:[#allocation26_spill]]  ;;  %s2503_s5 = int_to_ptr.vmem [resolvable:$true] %s242_s5 }
  0x7f   : > { %p2916_p6 = scmp.lt.s32.totalorder %s2203_s6, 4  ;;  %s2511_s3 = scalar_lea.sflag [#allocation4], %s229_s17 }
  0x81   : > { %p2507_p4 = pnand %p2916_p6, %p55_p9 }
  0x83   : > { %p1987_p11 = pneg %p2507_p4 }
  0x84   : > { %s2501_s11 = scalar_lea.hbm %s2915_s0, %s1400_s27  ;;  %s1990_s9 = scalar_lea.hbm %s2915_s0, 4096 }
  0x85   : > { %s1985_s14 = scalar_lea.hbm %s2501_s11, 1024  ;;  %p1991_p2 = scmp.lt.u32.totalorder %s2501_s11, %s2915_s0 }
  0x86   : > { %p1986_p10 = scmp.ne.s32.totalorder %s2501_s11, %s1985_s14  ;;  %p1992_p8 = scmp.lt.u32.totalorder %s1990_s9, %s1985_s14 }
  0x87   : > { %p1994_p3 = scmp.lt.u32.totalorder %s1985_s14, %s2501_s11 }
  0x88   : > { %p1988_p13 = pnand %p1987_p11, %p1986_p10  ;;  %p1993_p0 = por %p1992_p8, %p1991_p2 }
  0x8a   : > { %p1989_p12 = pneg %p1988_p13  ;;  %p1995_p5 = por %p1994_p3, %p1993_p0 }
  0x8c   : > { %p1996_p9 = pnand %p1995_p5, %p1989_p12 }
  0x8e   : > { %1999 = shalt.err (!%p1996_p9)
}
  0x8f   : > { %s2000_s17 = scalar_lea.vmem %s2503_s5, 1024  ;;  %s2210_s23 = smov [#allocation3]  }
  0x90   : > { %p2001_p1 = scmp.ne.s32.totalorder %s2503_s5, %s2000_s17  ;;  %s2005_s27 = sshll.u32 %s2210_s23, 4  ;;  %s2006_s27 = int_to_ptr.vmem [resolvable:$false] %s2005_s27 }
  0x91   : > { %s2007_s28 = scalar_lea.vmem %s2006_s27, 2048  ;;  %p2008_p13 = scmp.lt.s32.totalorder %s2503_s5, %s2006_s27 }
  0x92   : > { %p2003_p6 = pnand %p2001_p1, %p1987_p11  ;;  %p2009_p2 = scmp.lt.s32.totalorder %s2007_s28, %s2000_s17 }
  0x94   : > { %p2004_p10 = pneg %p2003_p6  ;;  %p2010_p8 = por %p2009_p2, %p2008_p13 }
  0x96   : > { %p2011_p0 = pnand %p2010_p8, %p2004_p10 }
  0x98   : > { %2014 = shalt.err (!%p2011_p0)
}
  0x99   : > { %s2211_s14 = smov 128   ;;  %s1392_s24 = sadd.s32 4294967294, %s2203_s6  }
  0x9a   : > { %1698 = dma.hbm_to_vmem [thread:$0]  (!%p2507_p4), %s2501_s11, 1024, %s2503_s5, %s2511_s3, %s2211_s14, %s2908_s12, %s2907_s13  }
  0x9b   : > { %s98_s9 = sadd.s32 1, %s2159_s20  ;;  %p105_p11 = scmp.ne.s32.totalorder %s2159_s20, %s2155_s19 }
  0x9c   : > { %p2918_p12 = scmp.eq.s32.totalorder %s2388_s16, 0  ;;  %p2919_p3 = scmp.eq.s32.totalorder %s2203_s6, 0 }
  0x9d   : > { %p111_p9 = scmp.ne.s32.totalorder %s2155_s19, %s2151_s18  ;;  %p2921_p1 = scmp.eq.s32.totalorder %s2318_s7, 3 }
  0x9e   : > { %s2548_s21 = scalar_select %p2918_p12, %s2159_s20, %s98_s9  }
  0x9f   : > { %p2552_p5 = por %p105_p11, %p2919_p3  ;;  %p2560_p6 = por %p2921_p1, %p105_p11 }
  0xa0   : > { %p183_p4 = scmp.eq.s32.totalorder %s1392_s24, 3  ;;  %p2923_p10 = scmp.eq.s32.totalorder %s2318_s7, 0 }
  0xa1   : > { %s2922_s23 = scalar_select %p2560_p6, 1, 0 }
  0xa2   : > { %p2566_p13 = por %p111_p9, %p2923_p10  ;;  %s275_s16 = sand.u32 1, %s2159_s20  }
  0xa3   : > { %p2571_p2 = por %p183_p4, %p111_p9  ;;  %s1404_s3 = sshll.u32 %s275_s16, 6 }
  0xa4   : > { %s2924_s5 = scalar_select %p2566_p13, 1, 0 }
  0xa5   : > { %s2925_s11 = scalar_select %p2571_p2, 1, 0 }
  0xa6   : > { %s1455_s27 = sshll.u32 %s2199_s30, 10  ;;  %s277_s24 = scalar_lea.vmem [#allocation8], %s1404_s3 }
  0xa7   : > { %s2579_s9 = scalar_lea.hbm %s2863_s2, %s1455_s27  ;;  %s284_s0 = sshll.u32 %s277_s24, 4  ;;  %s2581_s0 = int_to_ptr.vmem [resolvable:$true] %s284_s0 }
  0xa8   : > { %p2926_p8 = scmp.lt.s32.totalorder %s2203_s6, 4  ;;  %s2015_s16 = scalar_lea.hbm %s2579_s9, 1024 }
  0xa9   : > { %p2016_p11 = scmp.ne.s32.totalorder %s2579_s9, %s2015_s16  ;;  %s2020_s28 = scalar_lea.hbm %s2863_s2, 2048 }
  0xaa   : > { %p2587_p0 = pnand %p2926_p8, %p2552_p5  ;;  %p2021_p5 = scmp.lt.u32.totalorder %s2579_s9, %s2863_s2 }
  0xab   : > { %p2022_p1 = scmp.lt.u32.totalorder %s2020_s28, %s2015_s16  ;;  %p2024_p10 = scmp.lt.u32.totalorder %s2015_s16, %s2579_s9 }
  0xac   : > { %p2017_p12 = pneg %p2587_p0 }
  0xad   : > { %p2023_p4 = por %p2022_p1, %p2021_p5 }
  0xae   : > { %p2018_p3 = pnand %p2017_p12, %p2016_p11 }
  0xaf   : > { %p2025_p8 = por %p2024_p10, %p2023_p4 }
  0xb0   : > { %p2019_p9 = pneg %p2018_p3 }
  0xb2   : > { %p2026_p2 = pnand %p2025_p8, %p2019_p9 }
  0xb4   : > { %2029 = shalt.err (!%p2026_p2)
}
  0xb5   : > { %s2030_s24 = scalar_lea.vmem %s2581_s0, 1024  ;;  %s2212_s3 = smov [#allocation8]  }
  0xb6   : > { %p2031_p11 = scmp.ne.s32.totalorder %s2581_s0, %s2030_s24  ;;  %s2035_s27 = sshll.u32 %s2212_s3, 4  ;;  %s2036_s27 = int_to_ptr.vmem [resolvable:$false] %s2035_s27 }
  0xb7   : > { %s2037_s17 = scalar_lea.vmem %s2036_s27, 2048  ;;  %p2038_p13 = scmp.lt.s32.totalorder %s2581_s0, %s2036_s27 }
  0xb8   : > { %p2033_p3 = pnand %p2031_p11, %p2017_p12  ;;  %p2039_p5 = scmp.lt.s32.totalorder %s2037_s17, %s2030_s24 }
  0xba   : > { %p2034_p6 = pneg %p2033_p3  ;;  %p2040_p1 = por %p2039_p5, %p2038_p13 }
  0xbc   : > { %p2041_p4 = pnand %p2040_p1, %p2034_p6 }
  0xbe   : > { %2044 = shalt.err (!%p2041_p4)
}
  0xbf   : > { %1704 = dma.hbm_to_vmem [thread:$0]  (!%p2587_p0), %s2579_s9, 1024, %s2581_s0, %s2422_s15, %s2908_s12, %s2908_s12, %s2907_s13  }
  0xc0   : > { %p2928_p2 = scmp.ne.s32.totalorder %s2894_s8, 0 }
  0xc1   : > { %s298_s16 = sand.u32 (!%p2928_p2), 1, %s2179_s25  }
  0xc2   : > { %296 = sbr.rel (%p2928_p2) target bundleno = 935 (0x3a7), region = 40  ;;  %s1408_s28 = sshll.u32 (!%p2928_p2), %s298_s16, 6 }
  0xc3   : > { %s299_s14 = scalar_lea.sflag (!%p2928_p2), [#allocation4], %s298_s16  ;;  %s2623_s24 = scalar_lea.vmem (!%p2928_p2), [#allocation3], %s1408_s28 }
  0xc9   : > { %2130 = dma.done.wait (%p2493_p7), %s299_s14, 1024  }
  0xca   : > { %2132 = vsyncadd (%p2493_p7), %s299_s14, 4294966272  ;;  %s2929_s1 = sld [smem:[#allocation18_spill]]  ;;  %s2930_s3 = sld [smem:[#allocation25_spill]] }
  0xcb   : > { %s307_s27 = sand.u32 1, %s2318_s7  }
  0xcc   : > { %s308_s8 = scalar_lea.sflag [#allocation7], %s307_s27 }
  0xd0   : > { %s309_s0 = sand.u32 1, %s2929_s1   ;;  %p2931_p6 = scmp.ne.s32.totalorder %s2930_s3, 0 }
  0xd1   : > { %s1409_s15 = sshll.u32 %s309_s0, 6 }
  0xd2   : > { %s2631_s13 = scalar_lea.vmem [#allocation6], %s1409_s15 }
  0xd3   : > { %2134 = dma.done.wait (%p2931_p6), %s308_s8, 1024  }
  0xd4   : > { %2136 = vsyncadd (%p2931_p6), %s308_s8, 4294966272  ;;  %s2638_s12 = sand.u32 1, %s2155_s19   ;;  %p2932_p7 = scmp.ne.s32.totalorder %s2924_s5, 0 }
  0xd5   : > { %s1410_s22 = sshll.u32 %s2638_s12, 6 }
  0xd6   : > { %s2641_s9 = scalar_lea.vmem [#allocation8], %s1410_s22 }
  0xd7   : > { %2138 = dma.done.wait (%p2932_p7), %s308_s8, 1024  }
  0xd8   : > { %2140 = vsyncadd (%p2932_p7), %s308_s8, 4294966272  ;;  %p2933_p13 = scmp.eq.s32.totalorder %s2318_s7, 0 }
  0xda   : > { %2142 = dma.done.wait (%p2933_p13), [#allocation10], 2048   ;;  %p2934_p0 = pmov %p2933_p13 }
  0xdb   : > { %s1413_s17 = sshll.u32 %s2638_s12, 7  ;;  %s2935_s28 = sld [smem:[#allocation20_spill]] }
  0xdc   : > { %2144 = vsyncadd (%p2934_p0), [#allocation10], 4294965248  ;;  %s2652_s16 = scalar_lea.vmem [#allocation12], %s1413_s17 }
  0xe1   : > { %p1414_p12 = scmp.ne.s32.totalorder %s2935_s28, 0 }
  0xe2   : > { %v2213_v0 = vmov (!%p1414_p12), 0.0  }
  0xe3   : > { %373 = sbr.rel (%p1414_p12) target bundleno = 235 (0xeb), region = 64  ;;  %374 = vst [vmem:[#allocation2] sm:$0xff] (!%p1414_p12), %v2213_v0  ;;  %375 = vst [vmem:[#allocation2 + $0x8] sm:$0xff] (!%p1414_p12), %v2213_v0 }
  0xe4   : > { %376 = vst [vmem:[#allocation2 + $0x10] sm:$0xff] (!%p1414_p12), %v2213_v0  ;;  %377 = vst [vmem:[#allocation2 + $0x18] sm:$0xff] (!%p1414_p12), %v2213_v0 }
  0xe5   : > { %378 = vst [vmem:[#allocation2 + $0x20] sm:$0xff] (!%p1414_p12), %v2213_v0  ;;  %379 = vst [vmem:[#allocation2 + $0x28] sm:$0xff] (!%p1414_p12), %v2213_v0 }
  0xe6   : > { %380 = vst [vmem:[#allocation2 + $0x30] sm:$0xff] (!%p1414_p12), %v2213_v0  ;;  %381 = vst [vmem:[#allocation2 + $0x38] sm:$0xff] (!%p1414_p12), %v2213_v0 }
  0xe7   : > { %382 = vst [vmem:[#allocation2 + $0x40] sm:$0xff] (!%p1414_p12), %v2213_v0  ;;  %383 = vst [vmem:[#allocation2 + $0x48] sm:$0xff] (!%p1414_p12), %v2213_v0 }
  0xe8   : > { %384 = vst [vmem:[#allocation2 + $0x50] sm:$0xff] (!%p1414_p12), %v2213_v0  ;;  %385 = vst [vmem:[#allocation2 + $0x58] sm:$0xff] (!%p1414_p12), %v2213_v0 }
  0xe9   : > { %386 = vst [vmem:[#allocation2 + $0x60] sm:$0xff] (!%p1414_p12), %v2213_v0  ;;  %387 = vst [vmem:[#allocation2 + $0x68] sm:$0xff] (!%p1414_p12), %v2213_v0 }
  0xea   : > { %388 = vst [vmem:[#allocation2 + $0x70] sm:$0xff] %v2213_v0  ;;  %389 = vst [vmem:[#allocation2 + $0x78] sm:$0xff] %v2213_v0 }
  0xeb PF: > { %v1835_v1 = vld [vmem:[%s2631_s13] sm:$0xff]   ;;  %v1836_v2 = vld [vmem:[%s2631_s13 + $0x8] sm:$0xff]   ;;  %v1837_v3 = vld [vmem:[%s2631_s13 + $0x10] sm:$0xff]   ;;  %s2936_s7 = sld [smem:[#allocation20_spill]] }
  0xec   : > { %1544 = vmatprep.subr.bf16.mxu0 %v1835_v1  ;;  %1640 = vmatprep.subr.bf16.mxu1 %v1835_v1  ;;  %v1838_v4 = vld [vmem:[%s2631_s13 + $0x18] sm:$0xff]   ;;  %v1843_v5 = vld [vmem:[%s2623_s24] sm:$0xff]   ;;  %v1840_v8 = vld [vmem:[%s2631_s13 + $0x28] sm:$0xff]  }
  0xed   : > { %1545 = vmatpush3.bf16.msra.mxu0 %v1835_v1  ;;  %1648 = vmatpush3.bf16.msra.mxu1 %v1835_v1  ;;  %v1844_v6 = vld [vmem:[%s2623_s24 + $0x20] sm:$0xff]   ;;  %v1841_v9 = vld [vmem:[%s2631_s13 + $0x30] sm:$0xff]   ;;  %v1842_v10 = vld [vmem:[%s2631_s13 + $0x38] sm:$0xff]  }
  0xee   : > { %1546 = vmatprep.subr.bf16.mxu0 %v1836_v2  ;;  %1641 = vmatprep.subr.bf16.mxu1 %v1836_v2  ;;  %v1839_v7 = vld [vmem:[%s2631_s13 + $0x20] sm:$0xff]   ;;  %v1845_v11 = vld [vmem:[%s2623_s24 + $0x8] sm:$0xff]   ;;  %v1847_v13 = vld [vmem:[%s2623_s24 + $0x10] sm:$0xff]  }
  0xef   : > { %1560 = vmatprep.mubr.bf16.mxu0 %v1843_v5  ;;  %1568 = vmatprep.mubr.bf16.mxu1 %v1844_v6  ;;  %v1846_v12 = vld [vmem:[%s2623_s24 + $0x28] sm:$0xff]   ;;  %v1848_v14 = vld [vmem:[%s2623_s24 + $0x30] sm:$0xff]   ;;  %v1849_v15 = vld [vmem:[%s2623_s24 + $0x18] sm:$0xff]  }
  0xf0   : > { %v1850_v16 = vld [vmem:[%s2623_s24 + $0x38] sm:$0xff]   ;;  %v392_v17 = vld [vmem:[#allocation2 + $0x10] sm:$0xff]  ;;  %v390_v19 = vld [vmem:[#allocation2] sm:$0xff] }
  0xf1   : > { %1547 = vmatpush3.bf16.msra.mxu0 %v1836_v2  ;;  %1649 = vmatpush3.bf16.msra.mxu1 %v1836_v2  ;;  %v400_v18 = vld [vmem:[#allocation2 + $0x50] sm:$0xff]  ;;  %v398_v20 = vld [vmem:[#allocation2 + $0x40] sm:$0xff]  ;;  %v393_v23 = vld [vmem:[#allocation2 + $0x18] sm:$0xff]  ;;  %p1431_p9 = scmp.ne.s32.totalorder %s2936_s7, 1 }
  0xf2   : > { %1548 = vmatprep.subr.bf16.mxu0 %v1837_v3  ;;  %1642 = vmatprep.subr.bf16.mxu1 %v1837_v3  ;;  %v401_v24 = vld [vmem:[#allocation2 + $0x58] sm:$0xff]  ;;  %v391_v29 = vld [vmem:[#allocation2 + $0x8] sm:$0xff]  ;;  %v396_v41 = vld [vmem:[#allocation2 + $0x30] sm:$0xff] }
  0xf3   : > { %v399_v30 = vld [vmem:[#allocation2 + $0x48] sm:$0xff]  ;;  %v404_v42 = vld [vmem:[#allocation2 + $0x70] sm:$0xff]  ;;  %v394_v43 = vld [vmem:[#allocation2 + $0x20] sm:$0xff] }
  0xf4   : > { %v402_v44 = vld [vmem:[#allocation2 + $0x60] sm:$0xff]  ;;  %v397_v47 = vld [vmem:[#allocation2 + $0x38] sm:$0xff]  ;;  %v395_v53 = vld [vmem:[#allocation2 + $0x28] sm:$0xff] }
  0xf5   : > { %1549 = vmatpush3.bf16.msra.mxu0 %v1837_v3  ;;  %1650 = vmatpush3.bf16.msra.mxu1 %v1837_v3  ;;  %v405_v48 = vld [vmem:[#allocation2 + $0x78] sm:$0xff]  ;;  %v403_v54 = vld [vmem:[#allocation2 + $0x68] sm:$0xff]  ;;  %v1851_v1 = vld [vmem:[#allocation11] sm:$0xff] (!%p1431_p9)  }
  0xf6   : > { %1550 = vmatprep.subr.bf16.mxu0 %v1838_v4  ;;  %1643 = vmatprep.subr.bf16.mxu1 %v1838_v4  ;;  %v1852_v2 = vld [vmem:[#allocation9] sm:$0xff] (!%p1431_p9)   ;;  %v1853_v3 = vld [vmem:[#allocation11 + $0x8] sm:$0xff] (!%p1431_p9)   ;;  %v1855_v5 = vld [vmem:[#allocation11 + $0x10] sm:$0xff] (!%p1431_p9)  }
  0xf7   : > { %v1856_v6 = vld [vmem:[#allocation9 + $0x10] sm:$0xff] (!%p1431_p9)  }
  0xf9   : > { %1551 = vmatpush3.bf16.msra.mxu0 %v1838_v4  ;;  %1651 = vmatpush3.bf16.msra.mxu1 %v1838_v4  ;;  %v1854_v4 = vld [vmem:[#allocation9 + $0x8] sm:$0xff] (!%p1431_p9)  }
  0xfa   : > { %1552 = vmatprep.subr.bf16.mxu0 %v1839_v7  ;;  %1644 = vmatprep.subr.bf16.mxu1 %v1839_v7 }
  0xfd   : > { %1553 = vmatpush3.bf16.msra.mxu0 %v1839_v7  ;;  %1652 = vmatpush3.bf16.msra.mxu1 %v1839_v7  ;;  %v1857_v7 = vld [vmem:[#allocation11 + $0x18] sm:$0xff] (!%p1431_p9)  }
  0xfe   : > { %1554 = vmatprep.subr.bf16.mxu0 %v1840_v8  ;;  %1645 = vmatprep.subr.bf16.mxu1 %v1840_v8 }
 0x101   : > { %1555 = vmatpush3.bf16.msra.mxu0 %v1840_v8  ;;  %1653 = vmatpush3.bf16.msra.mxu1 %v1840_v8  ;;  %v1858_v8 = vld [vmem:[#allocation9 + $0x18] sm:$0xff] (!%p1431_p9)  }
 0x102   : > { %1556 = vmatprep.subr.bf16.mxu0 %v1841_v9  ;;  %1646 = vmatprep.subr.bf16.mxu1 %v1841_v9 }
 0x105   : > { %1557 = vmatpush3.bf16.msra.mxu0 %v1841_v9  ;;  %1654 = vmatpush3.bf16.msra.mxu1 %v1841_v9  ;;  %v1859_v9 = vld [vmem:[#allocation11 + $0x20] sm:$0xff] (!%p1431_p9)  }
 0x106   : > { %1558 = vmatprep.subr.bf16.mxu0 %v1842_v10  ;;  %1647 = vmatprep.subr.bf16.mxu1 %v1842_v10 }
 0x109   : > { %1559 = vmatpush3.bf16.msra.mxu0 %v1842_v10  ;;  %1655 = vmatpush3.bf16.msra.mxu1 %v1842_v10  ;;  %v1860_v10 = vld [vmem:[#allocation9 + $0x20] sm:$0xff] (!%p1431_p9)  }
 0x10a   : > { %1576 = vmatprep.subr.bf16.mxu1 (!%p1431_p9), %v1851_v1  ;;  %1608 = vmatprep.subr.bf16.mxu0 (!%p1431_p9), %v1852_v2 }
 0x10c   : > { %1561 = vmatmul.mubr.bf16.vlgmr.msra.gmra.mrb[0].mxu0 %v1845_v11  ;;  %1569 = vmatmul.mubr.bf16.vlgmr.msra.gmra.mrb[0].mxu1 %v1846_v12  ;;  %v1861_v11 = vld [vmem:[#allocation11 + $0x28] sm:$0xff] (!%p1431_p9)  }
 0x10d   : > { %1564 = vmatprep.mubr.bf16.mxu0 %v1847_v13  ;;  %1572 = vmatprep.mubr.bf16.mxu1 %v1848_v14  ;;  %v1458_v14 = vld [vmem:[%s2641_s9] sm:$0xff] (!%p1431_p9)  }
 0x10e   : > { %1577 = vmatpush3.bf16.msra.mxu1 (!%p1431_p9), %v1851_v1  ;;  %1609 = vmatpush3.bf16.msra.mxu0 (!%p1431_p9), %v1852_v2  ;;  %v1493_v2 = vld [vmem:[%s2641_s9 + $0x28] sm:$0xff] (!%p1431_p9)  }
 0x10f   : > { %1578 = vmatprep.subr.bf16.mxu1 (!%p1431_p9), %v1853_v3  ;;  %1610 = vmatprep.subr.bf16.mxu0 (!%p1431_p9), %v1854_v4 }
 0x112   : > { %1579 = vmatpush3.bf16.msra.mxu1 (!%p1431_p9), %v1853_v3  ;;  %1611 = vmatpush3.bf16.msra.mxu0 (!%p1431_p9), %v1854_v4 }
 0x113   : > { %1580 = vmatprep.subr.bf16.mxu1 (!%p1431_p9), %v1855_v5  ;;  %1612 = vmatprep.subr.bf16.mxu0 (!%p1431_p9), %v1856_v6 }
 0x114   : > { %1565 = vmatmul.mubr.bf16.gmra.mrb[4].mxu0 %v1849_v15  ;;  %1573 = vmatmul.mubr.bf16.gmra.mrb[4].mxu1 %v1850_v16  ;;  %v1862_v15 = vld [vmem:[#allocation9 + $0x28] sm:$0xff] (!%p1431_p9)   ;;  %v1459_v16 = vunpack.c.l.bf16 (!%p1431_p9), %v1458_v14 }
 0x116   : > { %1581 = vmatpush3.bf16.msra.mxu1 (!%p1431_p9), %v1855_v5  ;;  %1613 = vmatpush3.bf16.msra.mxu0 (!%p1431_p9), %v1856_v6  ;;  %v1494_v5 = vld [vmem:[%s2641_s9 + $0x30] sm:$0xff] (!%p1431_p9)  }
 0x117   : > { %1582 = vmatprep.subr.bf16.mxu1 (!%p1431_p9), %v1857_v7  ;;  %1614 = vmatprep.subr.bf16.mxu0 (!%p1431_p9), %v1858_v8 }
 0x11a   : > { %1583 = vmatpush3.bf16.msra.mxu1 (!%p1431_p9), %v1857_v7  ;;  %1615 = vmatpush3.bf16.msra.mxu0 (!%p1431_p9), %v1858_v8  ;;  %v1479_v7 = vunpack.c.l.bf16 (!%p1431_p9), %v1493_v2  ;;  %v1480_v8 = vunpack.c.h.bf16 (!%p1431_p9), %v1493_v2 }
 0x11b   : > { %1584 = vmatprep.subr.bf16.mxu1 (!%p1431_p9), %v1859_v9  ;;  %1616 = vmatprep.subr.bf16.mxu0 (!%p1431_p9), %v1860_v10 }
 0x11e   : > { %1585 = vmatpush3.bf16.msra.mxu1 (!%p1431_p9), %v1859_v9  ;;  %1617 = vmatpush3.bf16.msra.mxu0 (!%p1431_p9), %v1860_v10 }
 0x11f   : > { %1586 = vmatprep.subr.bf16.mxu1 (!%p1431_p9), %v1861_v11  ;;  %1618 = vmatprep.subr.bf16.mxu0 (!%p1431_p9), %v1862_v15 }
 0x122   : > { %1587 = vmatpush3.bf16.msra.mxu1 (!%p1431_p9), %v1861_v11  ;;  %1619 = vmatpush3.bf16.msra.mxu0 (!%p1431_p9), %v1862_v15 }
 0x1df   : > { %v1562_v21 = vpop.f32.mrb[0].mxu0  ;;  %v1570_v22 = vpop.f32.mrb[0].mxu1 }
 0x1e0   : > { %v633_v25 = vadd.f32 %v1562_v21, %v392_v17  ;;  %v641_v26 = vadd.f32 %v1570_v22, %v400_v18  ;;  %v568_v27 = vpop.f32.mrb[1].mxu0  ;;  %v600_v28 = vpop.f32.mrb[1].mxu1  ;;  %v1460_v17 = vunpack.c.h.bf16 (!%p1431_p9), %v1458_v14  ;;  %v1489_v22 = vld [vmem:[%s2641_s9 + $0x8] sm:$0xff] (!%p1431_p9)   ;;  %v1484_v14 = vunpack.c.h.bf16 (!%p1431_p9), %v1494_v5 }
 0x1e1   : > { %v631_v31 = vadd.f32 %v568_v27, %v390_v19  ;;  %v639_v32 = vadd.f32 %v600_v28, %v398_v20  ;;  %v1563_v33 = vpop.f32.mrb[2].mxu0  ;;  %v1571_v34 = vpop.f32.mrb[2].mxu1  ;;  %v1463_v28 = vunpack.c.l.bf16 (!%p1431_p9), %v1489_v22 }
 0x1e2   : > { %649 = vst [vmem:[#allocation2 + $0x10] sm:$0xff] %v633_v25  ;;  %657 = vst [vmem:[#allocation2 + $0x50] sm:$0xff] %v641_v26  ;;  %v634_v35 = vadd.f32 %v1563_v33, %v393_v23  ;;  %v642_v36 = vadd.f32 %v1571_v34, %v401_v24  ;;  %v571_v37 = vpop.f32.mrb[3].mxu0  ;;  %v603_v38 = vpop.f32.mrb[3].mxu1  ;;  %v1863_v23 = vld [vmem:[#allocation11 + $0x30] sm:$0xff] (!%p1431_p9)   ;;  %v1865_v34 = vld [vmem:[#allocation11 + $0x38] sm:$0xff] (!%p1431_p9)  }
 0x1e3   : > { %647 = vst [vmem:[#allocation2] sm:$0xff] %v631_v31  ;;  %655 = vst [vmem:[#allocation2 + $0x40] sm:$0xff] %v639_v32  ;;  %v632_v39 = vadd.f32 %v571_v37, %v391_v29  ;;  %v640_v40 = vadd.f32 %v603_v38, %v399_v30  ;;  %v1490_v24 = vld [vmem:[%s2641_s9 + $0x10] sm:$0xff] (!%p1431_p9)   ;;  %v1464_v29 = vunpack.c.h.bf16 (!%p1431_p9), %v1489_v22  ;;  %1588 = vmatprep.subr.bf16.mxu1 (!%p1431_p9), %v1863_v23  ;;  %v1866_v37 = vld [vmem:[#allocation9 + $0x38] sm:$0xff] (!%p1431_p9)  }
 0x1e4   : > { %650 = vst [vmem:[#allocation2 + $0x18] sm:$0xff] %v634_v35  ;;  %658 = vst [vmem:[#allocation2 + $0x58] sm:$0xff] %v642_v36  ;;  %v1864_v25 = vld [vmem:[#allocation9 + $0x30] sm:$0xff] (!%p1431_p9)   ;;  %v1467_v32 = vunpack.c.l.bf16 (!%p1431_p9), %v1490_v24  ;;  %v1468_v33 = vunpack.c.h.bf16 (!%p1431_p9), %v1490_v24  ;;  %1589 = vmatpush3.bf16.msra.mxu1 (!%p1431_p9), %v1863_v23  ;;  %v1495_v24 = vld [vmem:[%s2641_s9 + $0x38] sm:$0xff] (!%p1431_p9)  }
 0x1e5   : > { %648 = vst [vmem:[#allocation2 + $0x8] sm:$0xff] %v632_v39  ;;  %656 = vst [vmem:[#allocation2 + $0x48] sm:$0xff] %v640_v40  ;;  %1620 = vmatprep.subr.bf16.mxu0 (!%p1431_p9), %v1864_v25  ;;  %1590 = vmatprep.subr.bf16.mxu1 (!%p1431_p9), %v1865_v34 }
 0x1e6   : > { %1621 = vmatpush3.bf16.msra.mxu0 (!%p1431_p9), %v1864_v25 }
 0x1e7   : > { %v1566_v45 = vpop.f32.mrb[4].mxu0  ;;  %v1574_v46 = vpop.f32.mrb[4].mxu1  ;;  %666 = sbr.rel (%p1431_p9) target bundleno = 907 (0x38b), region = 68  ;;  %1622 = vmatprep.subr.bf16.mxu0 (!%p1431_p9), %v1866_v37 }
 0x1e8   : > { %v637_v49 = vadd.f32 %v1566_v45, %v396_v41  ;;  %v645_v50 = vadd.f32 %v1574_v46, %v404_v42  ;;  %v584_v51 = vpop.f32.mrb[5].mxu0  ;;  %v616_v52 = vpop.f32.mrb[5].mxu1  ;;  %1591 = vmatpush3.bf16.msra.mxu1 (!%p1431_p9), %v1865_v34 }
 0x1e9   : > { %v635_v55 = vadd.f32 %v584_v51, %v394_v43  ;;  %v643_v56 = vadd.f32 %v616_v52, %v402_v44  ;;  %v1567_v57 = vpop.f32.mrb[6].mxu0  ;;  %v1575_v58 = vpop.f32.mrb[6].mxu1  ;;  %v669_v30 = vld [vmem:[#allocation2 + $0x10] sm:$0xff] (!%p1431_p9)  ;;  %v1491_v44 = vld [vmem:[%s2641_s9 + $0x18] sm:$0xff] (!%p1431_p9)  }
 0x1ea   : > { %653 = vst [vmem:[#allocation2 + $0x30] sm:$0xff] %v637_v49  ;;  %661 = vst [vmem:[#allocation2 + $0x70] sm:$0xff] %v645_v50  ;;  %v638_v59 = vadd.f32 %v1567_v57, %v397_v47  ;;  %v646_v60 = vadd.f32 %v1575_v58, %v405_v48  ;;  %v587_v61 = vpop.f32.mrb[7].mxu0  ;;  %v619_v62 = vpop.f32.mrb[7].mxu1  ;;  %v667_v12 = vld [vmem:[#allocation2] sm:$0xff] (!%p1431_p9)  ;;  %v757_v38 = vmul.f32 (!%p1431_p9), %v1463_v28, %v669_v30  ;;  %v1471_v49 = vunpack.c.l.bf16 (!%p1431_p9), %v1491_v44  ;;  %v677_v11 = vld [vmem:[#allocation2 + $0x50] sm:$0xff] (!%p1431_p9) }
 0x1eb   : > { %651 = vst [vmem:[#allocation2 + $0x20] sm:$0xff] %v635_v55  ;;  %659 = vst [vmem:[#allocation2 + $0x60] sm:$0xff] %v643_v56  ;;  %v636_v63 = vadd.f32 %v587_v61, %v395_v53  ;;  %v644_v0 = vadd.f32 %v619_v62, %v403_v54  ;;  %v755_v18 = vmul.f32 (!%p1431_p9), %v1459_v16, %v667_v12  ;;  %v670_v31 = vld [vmem:[#allocation2 + $0x18] sm:$0xff] (!%p1431_p9)  ;;  %v1492_v47 = vld [vmem:[%s2641_s9 + $0x20] sm:$0xff] (!%p1431_p9)   ;;  %v1472_v50 = vunpack.c.h.bf16 (!%p1431_p9), %v1491_v44 }
 0x1ec   : > { %654 = vst [vmem:[#allocation2 + $0x38] sm:$0xff] %v638_v59  ;;  %662 = vst [vmem:[#allocation2 + $0x78] sm:$0xff] %v646_v60  ;;  %v668_v13 = vld [vmem:[#allocation2 + $0x8] sm:$0xff] (!%p1431_p9)  ;;  %v715_v20 = vadd.f32 (!%p1431_p9), %v1459_v16, %v667_v12  ;;  %v758_v39 = vmul.f32 (!%p1431_p9), %v1464_v29, %v670_v31  ;;  %v717_v40 = vadd.f32 (!%p1431_p9), %v1463_v28, %v669_v30  ;;  %v1475_v55 = vunpack.c.l.bf16 (!%p1431_p9), %v1492_v47  ;;  %v675_v58 = vld [vmem:[#allocation2 + $0x40] sm:$0xff] (!%p1431_p9) }
 0x1ed   : > { %652 = vst [vmem:[#allocation2 + $0x28] sm:$0xff] %v636_v63  ;;  %660 = vst [vmem:[#allocation2 + $0x68] sm:$0xff] %v644_v0  ;;  %v756_v19 = vmul.f32 (!%p1431_p9), %v1460_v17, %v668_v13  ;;  %v716_v21 = vadd.f32 (!%p1431_p9), %v1460_v17, %v668_v13  ;;  %v718_v41 = vadd.f32 (!%p1431_p9), %v1464_v29, %v670_v31  ;;  %v1476_v56 = vunpack.c.h.bf16 (!%p1431_p9), %v1492_v47  ;;  %v676_v59 = vld [vmem:[#allocation2 + $0x48] sm:$0xff] (!%p1431_p9)  ;;  %v678_v12 = vld [vmem:[#allocation2 + $0x58] sm:$0xff] (!%p1431_p9) }
 0x1ee   : > { %v772_v48 = vpack.c.bf16 %v758_v39, %v757_v38  ;;  %1623 = vmatpush3.bf16.msra.mxu0 %v1866_v37  ;;  %v763_v0 = vmul.f32 %v1475_v55, %v675_v58  ;;  %v723_v3 = vadd.f32 %v1475_v55, %v675_v58  ;;  %v1483_v13 = vunpack.c.l.bf16 %v1494_v5 }
 0x1ef   : > { %v771_v26 = vpack.c.bf16 %v756_v19, %v755_v18  ;;  %v731_v27 = vpack.c.bf16 %v716_v21, %v715_v20  ;;  %v732_v51 = vpack.c.bf16 %v718_v41, %v717_v40  ;;  %v764_v1 = vmul.f32 %v1476_v56, %v676_v59 }
 0x1f0   : > { %v724_v4 = vadd.f32 %v1476_v56, %v676_v59  ;;  %v765_v18 = vmul.f32 %v1479_v7, %v677_v11  ;;  %v766_v19 = vmul.f32 %v1480_v8, %v678_v12  ;;  %v725_v20 = vadd.f32 %v1479_v7, %v677_v11 }
 0x1f1   : > { %1592 = vmatprep.mubr.bf16.mxu1 %v771_v26  ;;  %1624 = vmatprep.mubr.bf16.mxu0 %v731_v27  ;;  %v673_v53 = vld [vmem:[#allocation2 + $0x30] sm:$0xff]  ;;  %v775_v10 = vpack.c.bf16 %v764_v1, %v763_v0  ;;  %v726_v21 = vadd.f32 %v1480_v8, %v678_v12  ;;  %v1487_v28 = vunpack.c.l.bf16 %v1495_v24  ;;  %v1488_v29 = vunpack.c.h.bf16 %v1495_v24 }
 0x1f2   : > { %v671_v35 = vld [vmem:[#allocation2 + $0x20] sm:$0xff]  ;;  %1593 = vmatmul.mubr.bf16.vlgmr.msra.gmra.mrb[0].mxu1 %v772_v48  ;;  %v761_v60 = vmul.f32 %v1471_v49, %v673_v53  ;;  %v721_v62 = vadd.f32 %v1471_v49, %v673_v53  ;;  %1625 = vmatmul.mubr.bf16.vlgmr.msra.gmra.mrb[0].mxu0 %v732_v51  ;;  %v735_v15 = vpack.c.bf16 %v724_v4, %v723_v3 }
 0x1f3   : > { %v759_v42 = vmul.f32 %v1467_v32, %v671_v35  ;;  %v719_v45 = vadd.f32 %v1467_v32, %v671_v35  ;;  %v674_v54 = vld [vmem:[#allocation2 + $0x38] sm:$0xff]  ;;  %v679_v16 = vld [vmem:[#allocation2 + $0x60] sm:$0xff]  ;;  %v776_v27 = vpack.c.bf16 %v766_v19, %v765_v18  ;;  %v736_v30 = vpack.c.bf16 %v726_v21, %v725_v20  ;;  %v681_v32 = vld [vmem:[#allocation2 + $0x70] sm:$0xff] }
 0x1f4   : > { %v672_v36 = vld [vmem:[#allocation2 + $0x28] sm:$0xff]  ;;  %v762_v61 = vmul.f32 %v1472_v50, %v674_v54  ;;  %v722_v63 = vadd.f32 %v1472_v50, %v674_v54  ;;  %v767_v22 = vmul.f32 %v1483_v13, %v679_v16  ;;  %v727_v25 = vadd.f32 %v1483_v13, %v679_v16 }
 0x1f5   : > { %v760_v43 = vmul.f32 %v1468_v33, %v672_v36  ;;  %v720_v46 = vadd.f32 %v1468_v33, %v672_v36  ;;  %v680_v17 = vld [vmem:[#allocation2 + $0x68] sm:$0xff]  ;;  %v682_v33 = vld [vmem:[#allocation2 + $0x78] sm:$0xff]  ;;  %v769_v35 = vmul.f32 %v1487_v28, %v681_v32  ;;  %v729_v37 = vadd.f32 %v1487_v28, %v681_v32 }
 0x1f6   : > { %v774_v6 = vpack.c.bf16 %v762_v61, %v761_v60  ;;  %v734_v9 = vpack.c.bf16 %v722_v63, %v721_v62  ;;  %v768_v23 = vmul.f32 %v1484_v14, %v680_v17  ;;  %v728_v26 = vadd.f32 %v1484_v14, %v680_v17 }
 0x1f7   : > { %v773_v52 = vpack.c.bf16 %v760_v43, %v759_v42  ;;  %v733_v57 = vpack.c.bf16 %v720_v46, %v719_v45  ;;  %v770_v36 = vmul.f32 %v1488_v29, %v682_v33  ;;  %v730_v38 = vadd.f32 %v1488_v29, %v682_v33 }
 0x1f8   : > { %v777_v31 = vpack.c.bf16 %v768_v23, %v767_v22  ;;  %v737_v34 = vpack.c.bf16 %v728_v26, %v727_v25 }
 0x1f9   : > { %1596 = vmatprep.mubr.bf16.mxu1 %v773_v52  ;;  %1628 = vmatprep.mubr.bf16.mxu0 %v733_v57  ;;  %v778_v39 = vpack.c.bf16 %v770_v36, %v769_v35  ;;  %v738_v40 = vpack.c.bf16 %v730_v38, %v729_v37 }
 0x1fa   : > { %1597 = vmatmul.mubr.bf16.gmra.mrb[4].mxu1 %v774_v6  ;;  %1629 = vmatmul.mubr.bf16.gmra.mrb[4].mxu0 %v734_v9 }
 0x1fb   : > { %1600 = vmatprep.mubr.bf16.mxu1 %v775_v10  ;;  %1632 = vmatprep.mubr.bf16.mxu0 %v735_v15 }
 0x202   : > { %1601 = vmatmul.mubr.bf16.gmra.mrb[8].mxu1 %v776_v27  ;;  %1633 = vmatmul.mubr.bf16.gmra.mrb[8].mxu0 %v736_v30 }
 0x203   : > { %1604 = vmatprep.mubr.bf16.mxu1 %v777_v31  ;;  %1636 = vmatprep.mubr.bf16.mxu0 %v737_v34 }
 0x20a   : > { %1605 = vmatmul.mubr.bf16.gmra.mrb[12].mxu1 %v778_v39  ;;  %1637 = vmatmul.mubr.bf16.gmra.mrb[12].mxu0 %v738_v40 }
 0x2c5   : > { %v1594_v41 = vpop.f32.mrb[0].mxu1  ;;  %v1626_v42 = vpop.f32.mrb[0].mxu0 }
 0x2c6   : > { %v877_v43 = vpop.f32.mrb[1].mxu1  ;;  %v1031_v44 = vadd.f32 %v1626_v42, %v1594_v41  ;;  %v1022_v45 = vpop.f32.mrb[1].mxu0 }
 0x2c7   : > { %v1595_v46 = vpop.f32.mrb[2].mxu1  ;;  %v1023_v47 = vadd.f32 %v1022_v45, %v877_v43  ;;  %v1627_v48 = vpop.f32.mrb[2].mxu0 }
 0x2c8   : > { %v880_v49 = vpop.f32.mrb[3].mxu1  ;;  %v1087_v50 = vmul.f32 0.2, %v1031_v44  ;;  %v1034_v51 = vadd.f32 %v1627_v48, %v1595_v46  ;;  %v1025_v52 = vpop.f32.mrb[3].mxu0 }
 0x2c9   : > { %v1085_v53 = vmul.f32 0.2, %v1023_v47  ;;  %v1026_v54 = vadd.f32 %v1025_v52, %v880_v49 }
 0x2ca   : > { %v1088_v55 = vmul.f32 0.2, %v1034_v51  ;;  %v2680_v56 = vmax.f32 %v1031_v44, %v1087_v50 }
 0x2cb   : > { %v1086_v57 = vmul.f32 0.2, %v1026_v54  ;;  %v2682_v58 = vmax.f32 %v1023_v47, %v1085_v53 }
 0x2cc   : > { %v2684_v59 = vmax.f32 %v1034_v51, %v1088_v55  ;;  %v1119_v61 = vmul.f32 %v2680_v56, %v2680_v56 }
 0x2cd   : > { %v1598_v60 = vpop.f32.mrb[4].mxu1  ;;  %v2688_v62 = vmax.f32 %v1026_v54, %v1086_v57  ;;  %v1630_v63 = vpop.f32.mrb[4].mxu0  ;;  %v1117_v1 = vmul.f32 %v2682_v58, %v2682_v58 }
 0x2ce   : > { %v893_v0 = vpop.f32.mrb[5].mxu1  ;;  %v1047_v2 = vadd.f32 %v1630_v63, %v1598_v60  ;;  %1137 = vadd.xlane.f32.xlu1 %v1119_v61  ;;  %v1038_v3 = vpop.f32.mrb[5].mxu0  ;;  %v1120_v11 = vmul.f32 %v2684_v59, %v2684_v59 }
 0x2cf   : > { %v1599_v4 = vpop.f32.mrb[6].mxu1  ;;  %v1039_v5 = vadd.f32 %v1038_v3, %v893_v0  ;;  %v1631_v6 = vpop.f32.mrb[6].mxu0  ;;  %1133 = vadd.xlane.f32.xlu0 %v1117_v1  ;;  %v1118_v14 = vmul.f32 %v2688_v62, %v2688_v62 }
 0x2d0   : > { %v896_v7 = vpop.f32.mrb[7].mxu1  ;;  %v1091_v8 = vmul.f32 0.2, %v1047_v2  ;;  %v1050_v9 = vadd.f32 %v1631_v6, %v1599_v4  ;;  %v1041_v10 = vpop.f32.mrb[7].mxu0 }
 0x2d1   : > { %v1089_v12 = vmul.f32 0.2, %v1039_v5  ;;  %v1042_v13 = vadd.f32 %v1041_v10, %v896_v7 }
 0x2d2   : > { %v2696_v15 = vmax.f32 %v1047_v2, %v1091_v8  ;;  %v1092_v16 = vmul.f32 0.2, %v1050_v9  ;;  %1139 = vadd.xlane.f32.xlu1 %v1120_v11 }
 0x2d3   : > { %v1090_v17 = vmul.f32 0.2, %v1042_v13  ;;  %1135 = vadd.xlane.f32.xlu0 %v1118_v14  ;;  %v2702_v21 = vmax.f32 %v1039_v5, %v1089_v12 }
 0x2d4   : > { %v2698_v18 = vmax.f32 %v1050_v9, %v1092_v16  ;;  %v1123_v20 = vmul.f32 %v2696_v15, %v2696_v15 }
 0x2d5   : > { %v1602_v19 = vpop.f32.mrb[8].mxu1  ;;  %v1634_v22 = vpop.f32.mrb[8].mxu0  ;;  %v2704_v24 = vmax.f32 %v1042_v13, %v1090_v17  ;;  %v1121_v37 = vmul.f32 %v2702_v21, %v2702_v21 }
 0x2d6   : > { %v909_v23 = vpop.f32.mrb[9].mxu1  ;;  %v1063_v25 = vadd.f32 %v1634_v22, %v1602_v19  ;;  %v1054_v26 = vpop.f32.mrb[9].mxu0  ;;  %v1124_v28 = vmul.f32 %v2698_v18, %v2698_v18 }
 0x2d7   : > { %v1603_v27 = vpop.f32.mrb[10].mxu1  ;;  %v1055_v29 = vadd.f32 %v1054_v26, %v909_v23  ;;  %v1635_v30 = vpop.f32.mrb[10].mxu0  ;;  %1145 = vadd.xlane.f32.xlu0 %v1123_v20  ;;  %v1122_v40 = vmul.f32 %v2704_v24, %v2704_v24 }
 0x2d8   : > { %v912_v31 = vpop.f32.mrb[11].mxu1  ;;  %v1095_v32 = vmul.f32 0.2, %v1063_v25  ;;  %v1066_v33 = vadd.f32 %v1635_v30, %v1603_v27  ;;  %1147 = vadd.xlane.f32.xlu1 %v1124_v28  ;;  %v1057_v34 = vpop.f32.mrb[11].mxu0 }
 0x2d9   : > { %v1093_v35 = vmul.f32 0.2, %v1055_v29  ;;  %v1058_v36 = vadd.f32 %v1057_v34, %v912_v31 }
 0x2da   : > { %v2710_v38 = vmax.f32 %v1063_v25, %v1095_v32  ;;  %v1096_v39 = vmul.f32 0.2, %v1066_v33 }
 0x2db   : > { %v1094_v41 = vmul.f32 0.2, %v1058_v36  ;;  %1141 = vadd.xlane.f32.xlu0 %v1121_v37  ;;  %v2718_v45 = vmax.f32 %v1055_v29, %v1093_v35 }
 0x2dc   : > { %v2714_v42 = vmax.f32 %v1066_v33, %v1096_v39  ;;  %1143 = vadd.xlane.f32.xlu1 %v1122_v40  ;;  %v1127_v44 = vmul.f32 %v2710_v38, %v2710_v38 }
 0x2dd   : > { %v1606_v43 = vpop.f32.mrb[12].mxu1  ;;  %v1638_v46 = vpop.f32.mrb[12].mxu0  ;;  %v2720_v48 = vmax.f32 %v1058_v36, %v1094_v41  ;;  %v1125_v1 = vmul.f32 %v2718_v45, %v2718_v45 }
 0x2de   : > { %v925_v47 = vpop.f32.mrb[13].mxu1  ;;  %v1079_v49 = vadd.f32 %v1638_v46, %v1606_v43  ;;  %v1070_v50 = vpop.f32.mrb[13].mxu0  ;;  %v1128_v52 = vmul.f32 %v2714_v42, %v2714_v42 }
 0x2df   : > { %v1607_v51 = vpop.f32.mrb[14].mxu1  ;;  %v1071_v53 = vadd.f32 %v1070_v50, %v925_v47  ;;  %v1639_v54 = vpop.f32.mrb[14].mxu0  ;;  %1153 = vadd.xlane.f32.xlu0 %v1127_v44  ;;  %v1126_v2 = vmul.f32 %v2720_v48, %v2720_v48 }
 0x2e0   : > { %v928_v55 = vpop.f32.mrb[15].mxu1  ;;  %v1082_v57 = vadd.f32 %v1639_v54, %v1607_v51  ;;  %v1073_v60 = vpop.f32.mrb[15].mxu0  ;;  %1155 = vadd.xlane.f32.xlu1 %v1128_v52  ;;  %v1099_v61 = vmul.f32 0.2, %v1079_v49 }
 0x2e1   : > { %v1097_v63 = vmul.f32 0.2, %v1071_v53  ;;  %v1074_v0 = vadd.f32 %v1073_v60, %v928_v55 }
 0x2e2   : > { %v1100_v4 = vmul.f32 0.2, %v1082_v57  ;;  %v2730_v6 = vmax.f32 %v1079_v49, %v1099_v61 }
 0x2e3   : > { %v2728_v3 = vmax.f32 %v1071_v53, %v1097_v63  ;;  %v1098_v5 = vmul.f32 0.2, %v1074_v0  ;;  %1149 = vadd.xlane.f32.xlu0 %v1125_v1 }
 0x2e4   : > { %1151 = vadd.xlane.f32.xlu1 %v1126_v2  ;;  %v2736_v9 = vmax.f32 %v1082_v57, %v1100_v4  ;;  %v1131_v11 = vmul.f32 %v2730_v6, %v2730_v6 }
 0x2e5   : > { %v2732_v7 = vmax.f32 %v1074_v0, %v1098_v5  ;;  %v1129_v8 = vmul.f32 %v2728_v3, %v2728_v3 }
 0x2e6   : > { %v1132_v12 = vmul.f32 %v2736_v9, %v2736_v9 }
 0x2e7   : > { %1157 = vadd.xlane.f32.xlu0 %v1129_v8  ;;  %v1130_v10 = vmul.f32 %v2732_v7, %v2732_v7 }
 0x2e9   : > { %1159 = vadd.xlane.f32.xlu1 %v1130_v10 }
 0x2eb   : > { %1161 = vadd.xlane.f32.xlu0 %v1131_v11 }
 0x2ed   : > { %1163 = vadd.xlane.f32.xlu1 %v1132_v12 }
 0x35b   : > { %v1138_v13 = vpop.xlane.xlu1 %1137 }
 0x35c   : > { %v1167_v14 = vmax.f32 %v1138_v13, 1e-24  ;;  %v1134_v16 = vpop.xlane.xlu0 %1133 }
 0x35d   : > { %v1165_v17 = vmax.f32 %v1134_v16, 1e-24 }
 0x35e   : > { %1867 = vrsqrt.f32 %v1167_v14 }
 0x35f   : > { %1869 = vrsqrt.f32 %v1165_v17  ;;  %v1140_v19 = vpop.xlane.xlu1 %1139 }
 0x360   : > { %v1168_v20 = vmax.f32 %v1140_v19, 1e-24  ;;  %v1136_v22 = vpop.xlane.xlu0 %1135 }
 0x361   : > { %v1166_v23 = vmax.f32 %v1136_v22, 1e-24 }
 0x362   : > { %1871 = vrsqrt.f32 %v1168_v20 }
 0x363   : > { %1873 = vrsqrt.f32 %v1166_v23 }
 0x364   : > { %v1146_v25 = vpop.xlane.xlu0 %1145 }
 0x365   : > { %v1171_v26 = vmax.f32 %v1146_v25, 1e-24  ;;  %v1148_v27 = vpop.xlane.xlu1 %1147 }
 0x366   : > { %v1172_v28 = vmax.f32 %v1148_v27, 1e-24 }
 0x367   : > { %1875 = vrsqrt.f32 %v1171_v26 }
 0x368   : > { %v1868_v29 = vpop.eup %1867  ;;  %1877 = vrsqrt.f32 %v1172_v28  ;;  %v1142_v30 = vpop.xlane.xlu0 %1141 }
 0x369   : > { %v1870_v31 = vpop.eup %1869  ;;  %v1199_v32 = vmul.f32 %v1868_v29, %v2680_v56  ;;  %v1169_v33 = vmax.f32 %v1142_v30, 1e-24  ;;  %v1144_v34 = vpop.xlane.xlu1 %1143 }
 0x36a   : > { %v1197_v35 = vmul.f32 %v1870_v31, %v2682_v58  ;;  %v1170_v36 = vmax.f32 %v1144_v34, 1e-24 }
 0x36b   : > { %1215 = vst [vmem:[%s2652_s16 + $0x10] sm:$0xff] %v1199_v32  ;;  %1879 = vrsqrt.f32 %v1169_v33 }
 0x36c   : > { %v1872_v37 = vpop.eup %1871  ;;  %1213 = vst [vmem:[%s2652_s16] sm:$0xff] %v1197_v35  ;;  %1881 = vrsqrt.f32 %v1170_v36  ;;  %v1154_v39 = vpop.xlane.xlu0 %1153 }
 0x36d   : > { %v1874_v40 = vpop.eup %1873  ;;  %v1200_v41 = vmul.f32 %v1872_v37, %v2684_v59  ;;  %v1175_v43 = vmax.f32 %v1154_v39, 1e-24  ;;  %v1156_v44 = vpop.xlane.xlu1 %1155 }
 0x36e   : > { %v1198_v56 = vmul.f32 %v1874_v40, %v2688_v62  ;;  %v1176_v46 = vmax.f32 %v1156_v44, 1e-24 }
 0x36f   : > { %1216 = vst [vmem:[%s2652_s16 + $0x18] sm:$0xff] %v1200_v41  ;;  %1883 = vrsqrt.f32 %v1175_v43 }
 0x370   : > { %1214 = vst [vmem:[%s2652_s16 + $0x8] sm:$0xff] %v1198_v56  ;;  %1885 = vrsqrt.f32 %v1176_v46  ;;  %v1150_v58 = vpop.xlane.xlu0 %1149 }
 0x371   : > { %v1876_v47 = vpop.eup %1875  ;;  %v1173_v49 = vmax.f32 %v1150_v58, 1e-24  ;;  %v1152_v50 = vpop.xlane.xlu1 %1151 }
 0x372   : > { %v1878_v51 = vpop.eup %1877  ;;  %v1203_v52 = vmul.f32 %v1876_v47, %v2696_v15  ;;  %v1174_v59 = vmax.f32 %v1152_v50, 1e-24 }
 0x373   : > { %v1204_v53 = vmul.f32 %v1878_v51, %v2698_v18  ;;  %1887 = vrsqrt.f32 %v1173_v49 }
 0x374   : > { %1219 = vst [vmem:[%s2652_s16 + $0x30] sm:$0xff] %v1203_v52  ;;  %1889 = vrsqrt.f32 %v1174_v59  ;;  %v1158_v62 = vpop.xlane.xlu0 %1157 }
 0x375   : > { %v1880_v54 = vpop.eup %1879  ;;  %1220 = vst [vmem:[%s2652_s16 + $0x38] sm:$0xff] %v1204_v53  ;;  %v1177_v55 = vmax.f32 %v1158_v62, 1e-24 }
 0x376   : > { %v1882_v57 = vpop.eup %1881  ;;  %v1201_v60 = vmul.f32 %v1880_v54, %v2702_v21  ;;  %v1160_v61 = vpop.xlane.xlu1 %1159 }
 0x377   : > { %v1202_v63 = vmul.f32 %v1882_v57, %v2704_v24  ;;  %1891 = vrsqrt.f32 %v1177_v55  ;;  %v1178_v15 = vmax.f32 %v1160_v61, 1e-24 }
 0x378   : > { %1217 = vst [vmem:[%s2652_s16 + $0x20] sm:$0xff] %v1201_v60  ;;  %v1162_v18 = vpop.xlane.xlu0 %1161 }
 0x379   : > { %v1884_v0 = vpop.eup %1883  ;;  %1218 = vst [vmem:[%s2652_s16 + $0x28] sm:$0xff] %v1202_v63  ;;  %1893 = vrsqrt.f32 %v1178_v15  ;;  %v1179_v1 = vmax.f32 %v1162_v18, 1e-24 }
 0x37a   : > { %v1886_v2 = vpop.eup %1885  ;;  %v1207_v4 = vmul.f32 %v1884_v0, %v2710_v38  ;;  %v1164_v5 = vpop.xlane.xlu1 %1163 }
 0x37b   : > { %v1208_v21 = vmul.f32 %v1886_v2, %v2714_v42  ;;  %1895 = vrsqrt.f32 %v1179_v1  ;;  %v1180_v24 = vmax.f32 %v1164_v5, 1e-24 }
 0x37c   : > { %1223 = vst [vmem:[%s2652_s16 + $0x50] sm:$0xff] %v1207_v4 }
 0x37d   : > { %v1888_v8 = vpop.eup %1887  ;;  %1224 = vst [vmem:[%s2652_s16 + $0x58] sm:$0xff] %v1208_v21  ;;  %1897 = vrsqrt.f32 %v1180_v24 }
 0x37e   : > { %v1890_v10 = vpop.eup %1889  ;;  %v1205_v11 = vmul.f32 %v1888_v8, %v2718_v45 }
 0x37f   : > { %v1206_v12 = vmul.f32 %v1890_v10, %v2720_v48 }
 0x380   : > { %1221 = vst [vmem:[%s2652_s16 + $0x40] sm:$0xff] %v1205_v11 }
 0x381   : > { %v1892_v38 = vpop.eup %1891  ;;  %1222 = vst [vmem:[%s2652_s16 + $0x48] sm:$0xff] %v1206_v12 }
 0x382   : > { %v1209_v13 = vmul.f32 %v1892_v38, %v2728_v3 }
 0x383   : > { %v1894_v42 = vpop.eup %1893 }
 0x384   : > { %1225 = vst [vmem:[%s2652_s16 + $0x60] sm:$0xff] %v1209_v13  ;;  %v1210_v14 = vmul.f32 %v1894_v42, %v2732_v7 }
 0x385   : > { %v1896_v16 = vpop.eup %1895 }
 0x386   : > { %1226 = vst [vmem:[%s2652_s16 + $0x68] sm:$0xff] %v1210_v14  ;;  %v1211_v17 = vmul.f32 %v1896_v16, %v2730_v6 }
 0x387   : > { %v1898_v19 = vpop.eup %1897 }
 0x388   : > { %1227 = vst [vmem:[%s2652_s16 + $0x70] sm:$0xff] %v1211_v17  ;;  %v1212_v20 = vmul.f32 %v1898_v19, %v2736_v9 }
 0x38a   : > { %1228 = vst [vmem:[%s2652_s16 + $0x78] sm:$0xff] %v1212_v20 }
 0x38b PF: > { %s2937_s5 = sld [smem:[#allocation21_spill]]  ;;  %s2938_s3 = sld [smem:[#allocation29_spill]] }
 0x38c   : > { %s1243_s0 = sshll.u32 %s2652_s16, 4  ;;  %s1230_s15 = scalar_lea.sflag [#allocation5], %s2638_s12  ;;  %s2783_s0 = int_to_ptr.vmem [resolvable:$true] %s1243_s0 }
 0x38d   : > { %s2045_s8 = scalar_lea.vmem %s2783_s0, 2048  ;;  %p2939_p8 = scmp.ne.s32.totalorder %s2922_s23, 0 }
 0x38e   : > { %p2046_p10 = scmp.ne.s32.totalorder %s2783_s0, %s2045_s8  ;;  %s2214_s13 = smov [#allocation12]  }
 0x38f   : > { %s2049_s22 = sshll.u32 %s2214_s13, 4  ;;  %s2050_s22 = int_to_ptr.vmem [resolvable:$false] %s2049_s22 }
 0x390   : > { %p2047_p11 = pnand %p2046_p10, %p2939_p8  ;;  %s2051_s9 = scalar_lea.vmem %s2050_s22, 4096 }
 0x391   : > { %s1456_s14 = sshll.u32 %s2937_s5, 11  ;;  %p2052_p5 = scmp.lt.s32.totalorder %s2783_s0, %s2050_s22 }
 0x392   : > { %s2780_s27 = scalar_lea.hbm %s2938_s3, %s1456_s14  ;;  %p2048_p3 = pneg %p2047_p11 }
 0x393   : > { %p2053_p1 = scmp.lt.s32.totalorder %s2051_s9, %s2045_s8 }
 0x395   : > { %p2054_p4 = por %p2053_p1, %p2052_p5 }
 0x397   : > { %p2055_p2 = pnand %p2054_p4, %p2048_p3 }
 0x399   : > { %2058 = shalt.err (!%p2055_p2)
}
 0x39a   : > { %s2059_s17 = scalar_lea.hbm %s2780_s27, 2048  ;;  %s2063_s7 = scalar_lea.hbm %s2938_s3, 4096 }
 0x39b   : > { %p2060_p6 = scmp.ne.s32.totalorder %s2780_s27, %s2059_s17  ;;  %p2064_p0 = scmp.lt.u32.totalorder %s2780_s27, %s2938_s3 }
 0x39c   : > { %p2065_p12 = scmp.lt.u32.totalorder %s2063_s7, %s2059_s17  ;;  %p2067_p10 = scmp.lt.u32.totalorder %s2059_s17, %s2780_s27 }
 0x39d   : > { %p2061_p7 = pnand %p2060_p6, %p2939_p8 }
 0x39e   : > { %p2066_p9 = por %p2065_p12, %p2064_p0 }
 0x39f   : > { %p2062_p13 = pneg %p2061_p7 }
 0x3a0   : > { %p2068_p11 = por %p2067_p10, %p2066_p9 }
 0x3a2   : > { %p2069_p3 = pnand %p2068_p11, %p2062_p13 }
 0x3a4   : > { %2072 = shalt.err (!%p2069_p3)
}
 0x3a5   : > { %s2215_s24 = smov 128   ;;  %s2216_s1 = smov 8  }
 0x3a6   : > { %1686 = dma.vmem_to_hbm [thread:$0]  (%p2939_p8), %s2783_s0, 2048, %s2780_s27, %s1230_s15, %s2215_s24, %s2215_s24, %s2216_s1  }
 0x3a7 PF: > { %p1714_p5 = scmp.ge.s32.totalorder %s2203_s6, 2  ;;  %s1258_s8 = sand.u32 1, %s2151_s18  }
 0x3a8   : > { %p2940_p1 = scmp.ne.s32.totalorder %s2925_s11, 0  ;;  %s1259_s13 = scalar_lea.sflag [#allocation5], %s1258_s8 }
 0x3aa   : > { %p1706_p4 = pnand %p1714_p5, %p2940_p1 }
 0x3ac   : > { %2146 = dma.done.wait (!%p1706_p4), %s1259_s13, 2048  }
 0x3ad   : > { %2148 = vsyncadd (!%p1706_p4), %s1259_s13, 4294965248  ;;  %s25_s6 = sadd.s32 1, %s2203_s6   ;;  %s2942_s23 = sld [smem:[#allocation18_spill]] }
 0x3ae   : > { %p2814_p2 = scmp.ge.s32.totalorder %s25_s6, 6   ;;  %s2943_s12 = sld [smem:[#allocation19_spill]] }
 0x3af   : > { %s2944_s27 = sld [smem:[#allocation24_spill]]  ;;  %s2945_s11 = sld [smem:[#allocation22_spill]] }
 0x3b0   : > { %s2946_s0 = sld [smem:[#allocation23_spill]]  ;;  %s2948_s18 = smov %s2155_s19 }
 0x3b1   : > { %s2949_s19 = smov %s2159_s20  ;;  %s2950_s20 = smov %s2548_s21 }
 0x3b2   : > { %s2954_s24 = smov %s2179_s25  ;;  %s2955_s25 = smov %s2183_s26 }
 0x3b3   : > { %s2951_s21 = smov %s2942_s23  ;;  %s2956_s26 = smov %s2481_s10 }
 0x3b4   : > { %s2952_s22 = smov %s2943_s12  ;;  %s2958_s28 = smov %s2199_s30 }
 0x3b5   : > { %s2953_s23 = smov %s2944_s27  ;;  %s2957_s27 = smov %s2195_s29 }
 0x3b6   : > { %s2959_s29 = smov %s2945_s11  ;;  %s2960_s30 = smov %s2946_s0 }
 0x3b7   :  { %24 = sbr.rel (!%p2814_p2) target bundleno = 18 (0x12), region = 125 }
 0x3be   :  { %1264 = vsyncpa [#allocation4], 1 }
 0x3bf   :  { %1266 = vsyncpa [#allocation4 + $0x1], 1 }
 0x3c0   :  { %1267 = vsyncpa [#allocation7], 1 }
 0x3c1   :  { %1269 = vsyncpa [#allocation7 + $0x1], 1 }
 0x3c2   :  { %1270 = vsyncpa [#allocation10], 1 }
 0x3c3   :  { %1271 = vsyncpa [#allocation5], 1 }
 0x3c4   :  { %1273 = vsyncpa [#allocation5 + $0x1], 1 }

</bundles_post_ra>
